<compile_context>
chip_gen: v7x
topology: tpu7x:2x2x1
jax: 0.10.0
libtpu: 0.0.40
codegen_flags: <defaults>
</compile_context>

<pallas_src>
import jax
import jax.numpy as jnp
from jax.experimental import pallas as pl
from jax.experimental.pallas import tpu as pltpu


INPUT_DIM = 13
INTERMEDIATE_DIM = 28
LATENT_DIM = 3
RELU_SLOPE = 0.1

PAD_DIM = 32             # per-sample padded feature width
G = 8                    # samples packed per row (block-diagonal packing)
FEAT = G * PAD_DIM       # 256 lanes
NUM_LAYERS = 10          # 4 enc + 1 fused mu/logvar head + 5 dec

MU_COL = 16              # mu lanes inside each 32-lane sample block
LV_COL = 19              # logvar lanes (adjacent to mu -> contiguous 16:22 slice)
EPS_COL = LV_COL         # eps lanes in packed input, aligned with logvar

TILE_ROWS_MAX = 512      # packed-row tile (= G * 512 = 4096 samples per grid step)

# (fan_in, fan_out) of the 11 original nn.Linear layers, in module order.
LAYER_DIMS = [
    (INPUT_DIM, INTERMEDIATE_DIM),            # enc 1
    (INTERMEDIATE_DIM, INTERMEDIATE_DIM),     # enc 2
    (INTERMEDIATE_DIM, INTERMEDIATE_DIM),     # enc 3
    (INTERMEDIATE_DIM, 2 * LATENT_DIM),       # enc 4
    (2 * LATENT_DIM, LATENT_DIM),             # mu head
    (2 * LATENT_DIM, LATENT_DIM),             # logvar head
    (LATENT_DIM, 2 * LATENT_DIM),             # dec 1
    (2 * LATENT_DIM, INTERMEDIATE_DIM),       # dec 2
    (INTERMEDIATE_DIM, INTERMEDIATE_DIM),     # dec 3
    (INTERMEDIATE_DIM, INTERMEDIATE_DIM),     # dec 4
    (INTERMEDIATE_DIM, INPUT_DIM),            # dec 5
]


def _cdiv(a, b):
    return -(-a // b)


def _round_up(a, b):
    return ((a + b - 1) // b) * b


def _leaky_relu(h):
    # max(h, slope*h): 2 VALU ops (mul + max) instead of cmp/mul/select.
    return jnp.maximum(h, RELU_SLOPE * h)


def _stable_sigmoid(x):
    z = jnp.exp(-jnp.abs(x))
    inv = 1.0 / (1.0 + z)
    return jnp.where(x >= 0, inv, z * inv)


def vae_eft_kernel(xin_ref, w_ref, b_ref, out_ref):
    """One batch tile of the full VAE forward pass (block-packed, G samples/row).

    xin_ref : (TR, 256)  per 32-lane block: x in 0:13, eps in 19:22, rest 0
    w_ref   : (10, 256, 256)  block-diag replicated, zero-padded weights (VMEM-resident)
    b_ref   : (10, 1, 256)    tiled, zero-padded biases
    out_ref : (TR, 256)  per block: x_hat -> 0:13, mu -> 16:19, logvar -> 19:22
    """

    def linear(h, layer):
        return (
            jnp.dot(h, w_ref[layer], preferred_element_type=jnp.float32)
            + b_ref[layer]
        )

    xin = xin_ref[...]                                     # (TR, 256) f32

    # lane index within each 32-lane sample block (computed once, reused)
    lane = jax.lax.broadcasted_iota(jnp.int32, xin.shape, 1) & (PAD_DIM - 1)

    # ----- encoder: 4 x (Linear -> LeakyReLU), uniform 256-wide matmuls -----
    h = xin
    h = _leaky_relu(linear(h, 0))                          # 13 -> 28 (eps lanes hit zero rows)
    h = _leaky_relu(linear(h, 1))                          # 28 -> 28
    h = _leaky_relu(linear(h, 2))                          # 28 -> 28
    h = _leaky_relu(linear(h, 3))                          # 28 -> 6

    # ----- fused mu|logvar head: mu -> lanes 16:19, logvar -> lanes 19:22 -----
    mlv = linear(h, 4)                                     # other lanes exactly 0

    # ----- reparameterization, no relayout -----
    # std*eps lands in lanes 19:22 (eps was packed there, aligned with logvar);
    # keep mu at 16:19; lanes >= 22 stay 0.  Decoder-entry weight (layer 5)
    # carries the 3x6 matrix at BOTH row bands 16:19 and 19:22, so
    # v @ W5 == (mu + std*eps) @ W_dec1 by linearity of the matmul.
    se = jnp.exp(0.5 * mlv) * xin                          # lanes 19:22 = std*eps
    v = jnp.where(lane < LV_COL, mlv, se)                  # mu | std*eps, rest 0 (finite)

    # ----- decoder: 4 x (Linear -> LeakyReLU) + Linear -> Sigmoid -----
    d = _leaky_relu(linear(v, 5))                          # 3  -> 6
    d = _leaky_relu(linear(d, 6))                          # 6  -> 28
    d = _leaky_relu(linear(d, 7))                          # 28 -> 28
    d = _leaky_relu(linear(d, 8))                          # 28 -> 28
    x_hat = _stable_sigmoid(linear(d, 9))                  # 28 -> 13

    # ----- single full-width, unmasked output store -----
    # per block: 0:13 x_hat, 13:16 sigmoid(0)=0.5 (unread), 16:22 mu|logvar, 22:32 zeros
    out_ref[...] = jnp.where(lane < MU_COL, x_hat, mlv)


def init_params(key):
    """Deterministic init matching nn.Linear defaults; w stored as (in, out)."""
    params = []
    for fan_in, fan_out in LAYER_DIMS:
        key, kw, kb = jax.random.split(key, 3)
        bound = 1.0 / jnp.sqrt(jnp.float32(fan_in))
        w = jax.random.uniform(kw, (fan_in, fan_out), jnp.float32, -bound, bound)
        b = jax.random.uniform(kb, (fan_out,), jnp.float32, -bound, bound)
        params.append((w, b))
    return params


def pack_params(params):
    """Pack the 11 (w, b) pairs into block-diag-replicated padded slabs.

    Layer 4 fuses the mu/logvar heads (mu cols 16:19, logvar cols 19:22).
    Layer 5 (decoder entry) places its 3x6 weight at row bands 16:19 AND 19:22
    so the kernel's (mu | std*eps) vector multiplies straight through.
    """
    ws = [w for (w, _) in params]
    bs = [b for (_, b) in params]

    def block(placements, bias_placements):
        bw = jnp.zeros((PAD_DIM, PAD_DIM), jnp.float32)
        for w, r0, c0 in placements:
            bw = bw.at[r0:r0 + w.shape[0], c0:c0 + w.shape[1]].set(w)
        bb = jnp.zeros((PAD_DIM,), jnp.float32)
        for b, c0 in bias_placements:
            bb = bb.at[c0:c0 + b.shape[0]].set(b)
        return bw, bb

    layer_blocks = [
        block([(ws[0], 0, 0)], [(bs[0], 0)]),                       # enc 1
        block([(ws[1], 0, 0)], [(bs[1], 0)]),                       # enc 2
        block([(ws[2], 0, 0)], [(bs[2], 0)]),                       # enc 3
        block([(ws[3], 0, 0)], [(bs[3], 0)]),                       # enc 4
        block([(ws[4], 0, MU_COL), (ws[5], 0, LV_COL)],             # fused mu|logvar
              [(bs[4], MU_COL), (bs[5], LV_COL)]),
        block([(ws[6], MU_COL, 0), (ws[6], LV_COL, 0)],             # dec 1 (dup rows)
              [(bs[6], 0)]),
        block([(ws[7], 0, 0)], [(bs[7], 0)]),                       # dec 2
        block([(ws[8], 0, 0)], [(bs[8], 0)]),                       # dec 3
        block([(ws[9], 0, 0)], [(bs[9], 0)]),                       # dec 4
        block([(ws[10], 0, 0)], [(bs[10], 0)]),                     # dec 5
    ]

    eye = jnp.eye(G, dtype=jnp.float32)
    wslab = jnp.stack([jnp.kron(eye, bw) for bw, _ in layer_blocks])       # (10,256,256)
    bslab = jnp.stack([jnp.tile(bb, G)[None, :] for _, bb in layer_blocks])  # (10,1,256)
    return wslab, bslab


@jax.jit
def vae_eft_forward(x, eps, wslab, bslab):
    batch = x.shape[0]
    rows = _cdiv(batch, G)
    # >= 2 grid steps for mid-size batches so both TensorCores are used on v7x.
    tile_rows = min(TILE_ROWS_MAX, _round_up(max(_cdiv(rows, 2), 1), 8))
    padded_rows = _round_up(max(rows, tile_rows), tile_rows)
    padded_batch = padded_rows * G

    # Pack per-sample 32-lane layout (x -> 0:13, eps -> 19:22) then fold
    # G samples per 256-lane row with a contiguous reshape.
    xf = x.astype(jnp.float32)
    ef = eps.astype(jnp.float32)
    z_a = jnp.zeros((batch, EPS_COL - INPUT_DIM), jnp.float32)
    z_b = jnp.zeros((batch, PAD_DIM - (EPS_COL + LATENT_DIM)), jnp.float32)
    xin32 = jnp.concatenate([xf, z_a, ef, z_b], axis=1)            # (batch, 32)
    xin32 = jnp.pad(xin32, ((0, padded_batch - batch), (0, 0)))
    xin = xin32.reshape(padded_rows, FEAT)

    grid = (padded_rows // tile_rows,)
    packed = pl.pallas_call(
        vae_eft_kernel,
        out_shape=jax.ShapeDtypeStruct((padded_rows, FEAT), jnp.float32),
        grid_spec=pltpu.PrefetchScalarGridSpec(
            num_scalar_prefetch=0,
            grid=grid,
            in_specs=[
                # streamed per batch tile
                pl.BlockSpec((tile_rows, FEAT), lambda i: (i, 0)),
                # weight/bias slabs stay resident across all grid steps
                pl.BlockSpec((NUM_LAYERS, FEAT, FEAT), lambda i: (0, 0, 0)),
                pl.BlockSpec((NUM_LAYERS, 1, FEAT), lambda i: (0, 0, 0)),
            ],
            out_specs=pl.BlockSpec((tile_rows, FEAT), lambda i: (i, 0)),
        ),
        compiler_params=pltpu.CompilerParams(
            dimension_semantics=("parallel",)
        ),
    )(xin, wslab, bslab)

    out32 = packed.reshape(padded_batch, PAD_DIM)[:batch]
    x_hat = out32[:, 0:INPUT_DIM]
    mu = out32[:, MU_COL:MU_COL + LATENT_DIM]
    logvar = out32[:, LV_COL:LV_COL + LATENT_DIM]
    return x_hat, mu, logvar


def vae_eft_reference(x, eps, params):
    """Pure-JAX reference mirroring the PyTorch module (unfused, unpadded)."""

    def lin(h, wb):
        w, b = wb
        return h @ w + b

    def lrelu(h):
        return jnp.where(h > 0, h, RELU_SLOPE * h)

    h = x
    for l in range(4):
        h = lrelu(lin(h, params[l]))
    mu = lin(h, params[4])
    logvar = lin(h, params[5])
    std = jnp.exp(0.5 * logvar)
    z = mu + std * eps
    d = z
    for l in range(6, 10):
        d = lrelu(lin(d, params[l]))
    x_hat = jax.nn.sigmoid(lin(d, params[10]))
    return x_hat, mu, logvar


if __name__ == "__main__":
    key = jax.random.PRNGKey(0)
    k_params, k_x, k_eps = jax.random.split(key, 3)

    batch = 8
    params = init_params(k_params)
    wslab, bslab = pack_params(params)

    x = jax.random.normal(k_x, (batch, INPUT_DIM), jnp.float32)
    eps = jax.random.normal(k_eps, (batch, LATENT_DIM), jnp.float32)

    x_hat, mu, logvar = vae_eft_forward(x, eps, wslab, bslab)
    jax.block_until_ready((x_hat, mu, logvar))

    # correctness check vs pure-JAX reference (unfused, unpadded math)
    rx, rmu, rlv = vae_eft_reference(x, eps, params)
    assert x_hat.shape == (batch, INPUT_DIM)
    assert mu.shape == (batch, LATENT_DIM)
    assert logvar.shape == (batch, LATENT_DIM)
    assert jnp.allclose(x_hat, rx, atol=1e-4, rtol=1e-4)
    assert jnp.allclose(mu, rmu, atol=1e-4, rtol=1e-4)
    assert jnp.allclose(logvar, rlv, atol=1e-4, rtol=1e-4)

    print("KERNEL_OK")
</pallas_src>

<mosaic_0001>
module attributes {stable_mosaic.version = 11 : i64} {
  func.func @vae_eft_kernel(%arg0: i32, %arg1: memref<8x256xf32, #tpu.memory_space<vmem>>, %arg2: memref<10x256x256xf32, #tpu.memory_space<vmem>>, %arg3: memref<10x1x256xf32, #tpu.memory_space<vmem>>, %arg4: memref<8x256xf32, #tpu.memory_space<vmem>>) attributes {dimension_semantics = [#tpu.dimension_semantics<parallel>], iteration_bounds = array<i64: 1>, scalar_prefetch = 0 : i64, scratch_operands = 0 : i64, tpu.core_type = #tpu.core_type<tc>, window_params = [{transform_indices = @transform_0, window_bounds = array<i64: 8, 256>}, {pipeline_mode = #tpu.pipeline_mode<synchronous>, transform_indices = @transform_1, window_bounds = array<i64: 10, 256, 256>}, {pipeline_mode = #tpu.pipeline_mode<synchronous>, transform_indices = @transform_2, window_bounds = array<i64: 10, 1, 256>}, {transform_indices = @transform_3, window_bounds = array<i64: 8, 256>}]} {
    %c0 = arith.constant 0 : index
    %c0_0 = arith.constant 0 : index
    %0 = vector.load %arg1[%c0, %c0_0] : memref<8x256xf32, #tpu.memory_space<vmem>>, vector<8x256xf32>
    %1 = tpu.iota {dimensions = array<i32: 1>} : vector<8x256xi32>
    %c31_i32 = arith.constant 31 : i32
    %2 = vector.broadcast %c31_i32 : i32 to vector<8x256xi32>
    %3 = arith.andi %1, %2 : vector<8x256xi32>
    %c0_1 = arith.constant 0 : index
    %c0_2 = arith.constant 0 : index
    %c0_3 = arith.constant 0 : index
    %4 = vector.load %arg2[%c0_1, %c0_2, %c0_3] : memref<10x256x256xf32, #tpu.memory_space<vmem>>, vector<1x256x256xf32>
    %5 = vector.shape_cast %4 : vector<1x256x256xf32> to vector<256x256xf32>
    %cst = arith.constant dense<0.000000e+00> : vector<8x256xf32>
    %6 = tpu.matmul %0, %5, %cst {dimension_numbers = #tpu.dot_dimension_numbers<[1], [0], [0], [1], [0, 0, 1, 1], [], []>} : vector<8x256xf32>, vector<256x256xf32>, vector<8x256xf32> -> vector<8x256xf32>
    %c0_4 = arith.constant 0 : index
    %c0_5 = arith.constant 0 : index
    %c0_6 = arith.constant 0 : index
    %7 = vector.load %arg3[%c0_4, %c0_5, %c0_6] : memref<10x1x256xf32, #tpu.memory_space<vmem>>, vector<1x1x256xf32>
    %8 = vector.shape_cast %7 : vector<1x1x256xf32> to vector<1x256xf32>
    %9 = vector.broadcast %8 : vector<1x256xf32> to vector<8x256xf32>
    %10 = arith.addf %6, %9 : vector<8x256xf32>
    %cst_7 = arith.constant 1.000000e-01 : f32
    %11 = vector.broadcast %cst_7 : f32 to vector<8x256xf32>
    %12 = arith.mulf %11, %10 : vector<8x256xf32>
    %13 = arith.maximumf %10, %12 : vector<8x256xf32>
    %c1 = arith.constant 1 : index
    %c0_8 = arith.constant 0 : index
    %c0_9 = arith.constant 0 : index
    %14 = vector.load %arg2[%c1, %c0_8, %c0_9] : memref<10x256x256xf32, #tpu.memory_space<vmem>>, vector<1x256x256xf32>
    %15 = vector.shape_cast %14 : vector<1x256x256xf32> to vector<256x256xf32>
    %cst_10 = arith.constant dense<0.000000e+00> : vector<8x256xf32>
    %16 = tpu.matmul %13, %15, %cst_10 {dimension_numbers = #tpu.dot_dimension_numbers<[1], [0], [0], [1], [0, 0, 1, 1], [], []>} : vector<8x256xf32>, vector<256x256xf32>, vector<8x256xf32> -> vector<8x256xf32>
    %c1_11 = arith.constant 1 : index
    %c0_12 = arith.constant 0 : index
    %c0_13 = arith.constant 0 : index
    %17 = vector.load %arg3[%c1_11, %c0_12, %c0_13] : memref<10x1x256xf32, #tpu.memory_space<vmem>>, vector<1x1x256xf32>
    %18 = vector.shape_cast %17 : vector<1x1x256xf32> to vector<1x256xf32>
    %19 = vector.broadcast %18 : vector<1x256xf32> to vector<8x256xf32>
    %20 = arith.addf %16, %19 : vector<8x256xf32>
    %cst_14 = arith.constant 1.000000e-01 : f32
    %21 = vector.broadcast %cst_14 : f32 to vector<8x256xf32>
    %22 = arith.mulf %21, %20 : vector<8x256xf32>
    %23 = arith.maximumf %20, %22 : vector<8x256xf32>
    %c2 = arith.constant 2 : index
    %c0_15 = arith.constant 0 : index
    %c0_16 = arith.constant 0 : index
    %24 = vector.load %arg2[%c2, %c0_15, %c0_16] : memref<10x256x256xf32, #tpu.memory_space<vmem>>, vector<1x256x256xf32>
    %25 = vector.shape_cast %24 : vector<1x256x256xf32> to vector<256x256xf32>
    %cst_17 = arith.constant dense<0.000000e+00> : vector<8x256xf32>
    %26 = tpu.matmul %23, %25, %cst_17 {dimension_numbers = #tpu.dot_dimension_numbers<[1], [0], [0], [1], [0, 0, 1, 1], [], []>} : vector<8x256xf32>, vector<256x256xf32>, vector<8x256xf32> -> vector<8x256xf32>
    %c2_18 = arith.constant 2 : index
    %c0_19 = arith.constant 0 : index
    %c0_20 = arith.constant 0 : index
    %27 = vector.load %arg3[%c2_18, %c0_19, %c0_20] : memref<10x1x256xf32, #tpu.memory_space<vmem>>, vector<1x1x256xf32>
    %28 = vector.shape_cast %27 : vector<1x1x256xf32> to vector<1x256xf32>
    %29 = vector.broadcast %28 : vector<1x256xf32> to vector<8x256xf32>
    %30 = arith.addf %26, %29 : vector<8x256xf32>
    %cst_21 = arith.constant 1.000000e-01 : f32
    %31 = vector.broadcast %cst_21 : f32 to vector<8x256xf32>
    %32 = arith.mulf %31, %30 : vector<8x256xf32>
    %33 = arith.maximumf %30, %32 : vector<8x256xf32>
    %c3 = arith.constant 3 : index
    %c0_22 = arith.constant 0 : index
    %c0_23 = arith.constant 0 : index
    %34 = vector.load %arg2[%c3, %c0_22, %c0_23] : memref<10x256x256xf32, #tpu.memory_space<vmem>>, vector<1x256x256xf32>
    %35 = vector.shape_cast %34 : vector<1x256x256xf32> to vector<256x256xf32>
    %cst_24 = arith.constant dense<0.000000e+00> : vector<8x256xf32>
    %36 = tpu.matmul %33, %35, %cst_24 {dimension_numbers = #tpu.dot_dimension_numbers<[1], [0], [0], [1], [0, 0, 1, 1], [], []>} : vector<8x256xf32>, vector<256x256xf32>, vector<8x256xf32> -> vector<8x256xf32>
    %c3_25 = arith.constant 3 : index
    %c0_26 = arith.constant 0 : index
    %c0_27 = arith.constant 0 : index
    %37 = vector.load %arg3[%c3_25, %c0_26, %c0_27] : memref<10x1x256xf32, #tpu.memory_space<vmem>>, vector<1x1x256xf32>
    %38 = vector.shape_cast %37 : vector<1x1x256xf32> to vector<1x256xf32>
    %39 = vector.broadcast %38 : vector<1x256xf32> to vector<8x256xf32>
    %40 = arith.addf %36, %39 : vector<8x256xf32>
    %cst_28 = arith.constant 1.000000e-01 : f32
    %41 = vector.broadcast %cst_28 : f32 to vector<8x256xf32>
    %42 = arith.mulf %41, %40 : vector<8x256xf32>
    %43 = arith.maximumf %40, %42 : vector<8x256xf32>
    %c4 = arith.constant 4 : index
    %c0_29 = arith.constant 0 : index
    %c0_30 = arith.constant 0 : index
    %44 = vector.load %arg2[%c4, %c0_29, %c0_30] : memref<10x256x256xf32, #tpu.memory_space<vmem>>, vector<1x256x256xf32>
    %45 = vector.shape_cast %44 : vector<1x256x256xf32> to vector<256x256xf32>
    %cst_31 = arith.constant dense<0.000000e+00> : vector<8x256xf32>
    %46 = tpu.matmul %43, %45, %cst_31 {dimension_numbers = #tpu.dot_dimension_numbers<[1], [0], [0], [1], [0, 0, 1, 1], [], []>} : vector<8x256xf32>, vector<256x256xf32>, vector<8x256xf32> -> vector<8x256xf32>
    %c4_32 = arith.constant 4 : index
    %c0_33 = arith.constant 0 : index
    %c0_34 = arith.constant 0 : index
    %47 = vector.load %arg3[%c4_32, %c0_33, %c0_34] : memref<10x1x256xf32, #tpu.memory_space<vmem>>, vector<1x1x256xf32>
    %48 = vector.shape_cast %47 : vector<1x1x256xf32> to vector<1x256xf32>
    %49 = vector.broadcast %48 : vector<1x256xf32> to vector<8x256xf32>
    %50 = arith.addf %46, %49 : vector<8x256xf32>
    %cst_35 = arith.constant 5.000000e-01 : f32
    %51 = vector.broadcast %cst_35 : f32 to vector<8x256xf32>
    %52 = arith.mulf %51, %50 : vector<8x256xf32>
    %53 = math.exp %52 : vector<8x256xf32>
    %54 = arith.mulf %53, %0 : vector<8x256xf32>
    %c19_i32 = arith.constant 19 : i32
    %55 = vector.broadcast %c19_i32 : i32 to vector<8x256xi32>
    %56 = arith.cmpi slt, %3, %55 : vector<8x256xi32>
    %57 = arith.select %56, %50, %54 : vector<8x256xi1>, vector<8x256xf32>
    %c5 = arith.constant 5 : index
    %c0_36 = arith.constant 0 : index
    %c0_37 = arith.constant 0 : index
    %58 = vector.load %arg2[%c5, %c0_36, %c0_37] : memref<10x256x256xf32, #tpu.memory_space<vmem>>, vector<1x256x256xf32>
    %59 = vector.shape_cast %58 : vector<1x256x256xf32> to vector<256x256xf32>
    %cst_38 = arith.constant dense<0.000000e+00> : vector<8x256xf32>
    %60 = tpu.matmul %57, %59, %cst_38 {dimension_numbers = #tpu.dot_dimension_numbers<[1], [0], [0], [1], [0, 0, 1, 1], [], []>} : vector<8x256xf32>, vector<256x256xf32>, vector<8x256xf32> -> vector<8x256xf32>
    %c5_39 = arith.constant 5 : index
    %c0_40 = arith.constant 0 : index
    %c0_41 = arith.constant 0 : index
    %61 = vector.load %arg3[%c5_39, %c0_40, %c0_41] : memref<10x1x256xf32, #tpu.memory_space<vmem>>, vector<1x1x256xf32>
    %62 = vector.shape_cast %61 : vector<1x1x256xf32> to vector<1x256xf32>
    %63 = vector.broadcast %62 : vector<1x256xf32> to vector<8x256xf32>
    %64 = arith.addf %60, %63 : vector<8x256xf32>
    %cst_42 = arith.constant 1.000000e-01 : f32
    %65 = vector.broadcast %cst_42 : f32 to vector<8x256xf32>
    %66 = arith.mulf %65, %64 : vector<8x256xf32>
    %67 = arith.maximumf %64, %66 : vector<8x256xf32>
    %c6 = arith.constant 6 : index
    %c0_43 = arith.constant 0 : index
    %c0_44 = arith.constant 0 : index
    %68 = vector.load %arg2[%c6, %c0_43, %c0_44] : memref<10x256x256xf32, #tpu.memory_space<vmem>>, vector<1x256x256xf32>
    %69 = vector.shape_cast %68 : vector<1x256x256xf32> to vector<256x256xf32>
    %cst_45 = arith.constant dense<0.000000e+00> : vector<8x256xf32>
    %70 = tpu.matmul %67, %69, %cst_45 {dimension_numbers = #tpu.dot_dimension_numbers<[1], [0], [0], [1], [0, 0, 1, 1], [], []>} : vector<8x256xf32>, vector<256x256xf32>, vector<8x256xf32> -> vector<8x256xf32>
    %c6_46 = arith.constant 6 : index
    %c0_47 = arith.constant 0 : index
    %c0_48 = arith.constant 0 : index
    %71 = vector.load %arg3[%c6_46, %c0_47, %c0_48] : memref<10x1x256xf32, #tpu.memory_space<vmem>>, vector<1x1x256xf32>
    %72 = vector.shape_cast %71 : vector<1x1x256xf32> to vector<1x256xf32>
    %73 = vector.broadcast %72 : vector<1x256xf32> to vector<8x256xf32>
    %74 = arith.addf %70, %73 : vector<8x256xf32>
    %cst_49 = arith.constant 1.000000e-01 : f32
    %75 = vector.broadcast %cst_49 : f32 to vector<8x256xf32>
    %76 = arith.mulf %75, %74 : vector<8x256xf32>
    %77 = arith.maximumf %74, %76 : vector<8x256xf32>
    %c7 = arith.constant 7 : index
    %c0_50 = arith.constant 0 : index
    %c0_51 = arith.constant 0 : index
    %78 = vector.load %arg2[%c7, %c0_50, %c0_51] : memref<10x256x256xf32, #tpu.memory_space<vmem>>, vector<1x256x256xf32>
    %79 = vector.shape_cast %78 : vector<1x256x256xf32> to vector<256x256xf32>
    %cst_52 = arith.constant dense<0.000000e+00> : vector<8x256xf32>
    %80 = tpu.matmul %77, %79, %cst_52 {dimension_numbers = #tpu.dot_dimension_numbers<[1], [0], [0], [1], [0, 0, 1, 1], [], []>} : vector<8x256xf32>, vector<256x256xf32>, vector<8x256xf32> -> vector<8x256xf32>
    %c7_53 = arith.constant 7 : index
    %c0_54 = arith.constant 0 : index
    %c0_55 = arith.constant 0 : index
    %81 = vector.load %arg3[%c7_53, %c0_54, %c0_55] : memref<10x1x256xf32, #tpu.memory_space<vmem>>, vector<1x1x256xf32>
    %82 = vector.shape_cast %81 : vector<1x1x256xf32> to vector<1x256xf32>
    %83 = vector.broadcast %82 : vector<1x256xf32> to vector<8x256xf32>
    %84 = arith.addf %80, %83 : vector<8x256xf32>
    %cst_56 = arith.constant 1.000000e-01 : f32
    %85 = vector.broadcast %cst_56 : f32 to vector<8x256xf32>
    %86 = arith.mulf %85, %84 : vector<8x256xf32>
    %87 = arith.maximumf %84, %86 : vector<8x256xf32>
    %c8 = arith.constant 8 : index
    %c0_57 = arith.constant 0 : index
    %c0_58 = arith.constant 0 : index
    %88 = vector.load %arg2[%c8, %c0_57, %c0_58] : memref<10x256x256xf32, #tpu.memory_space<vmem>>, vector<1x256x256xf32>
    %89 = vector.shape_cast %88 : vector<1x256x256xf32> to vector<256x256xf32>
    %cst_59 = arith.constant dense<0.000000e+00> : vector<8x256xf32>
    %90 = tpu.matmul %87, %89, %cst_59 {dimension_numbers = #tpu.dot_dimension_numbers<[1], [0], [0], [1], [0, 0, 1, 1], [], []>} : vector<8x256xf32>, vector<256x256xf32>, vector<8x256xf32> -> vector<8x256xf32>
    %c8_60 = arith.constant 8 : index
    %c0_61 = arith.constant 0 : index
    %c0_62 = arith.constant 0 : index
    %91 = vector.load %arg3[%c8_60, %c0_61, %c0_62] : memref<10x1x256xf32, #tpu.memory_space<vmem>>, vector<1x1x256xf32>
    %92 = vector.shape_cast %91 : vector<1x1x256xf32> to vector<1x256xf32>
    %93 = vector.broadcast %92 : vector<1x256xf32> to vector<8x256xf32>
    %94 = arith.addf %90, %93 : vector<8x256xf32>
    %cst_63 = arith.constant 1.000000e-01 : f32
    %95 = vector.broadcast %cst_63 : f32 to vector<8x256xf32>
    %96 = arith.mulf %95, %94 : vector<8x256xf32>
    %97 = arith.maximumf %94, %96 : vector<8x256xf32>
    %c9 = arith.constant 9 : index
    %c0_64 = arith.constant 0 : index
    %c0_65 = arith.constant 0 : index
    %98 = vector.load %arg2[%c9, %c0_64, %c0_65] : memref<10x256x256xf32, #tpu.memory_space<vmem>>, vector<1x256x256xf32>
    %99 = vector.shape_cast %98 : vector<1x256x256xf32> to vector<256x256xf32>
    %cst_66 = arith.constant dense<0.000000e+00> : vector<8x256xf32>
    %100 = tpu.matmul %97, %99, %cst_66 {dimension_numbers = #tpu.dot_dimension_numbers<[1], [0], [0], [1], [0, 0, 1, 1], [], []>} : vector<8x256xf32>, vector<256x256xf32>, vector<8x256xf32> -> vector<8x256xf32>
    %c9_67 = arith.constant 9 : index
    %c0_68 = arith.constant 0 : index
    %c0_69 = arith.constant 0 : index
    %101 = vector.load %arg3[%c9_67, %c0_68, %c0_69] : memref<10x1x256xf32, #tpu.memory_space<vmem>>, vector<1x1x256xf32>
    %102 = vector.shape_cast %101 : vector<1x1x256xf32> to vector<1x256xf32>
    %103 = vector.broadcast %102 : vector<1x256xf32> to vector<8x256xf32>
    %104 = arith.addf %100, %103 : vector<8x256xf32>
    %105 = math.absf %104 : vector<8x256xf32>
    %cst_70 = arith.constant 0.000000e+00 : f32
    %106 = vector.broadcast %cst_70 : f32 to vector<8x256xf32>
    %107 = arith.subf %106, %105 : vector<8x256xf32>
    %108 = math.exp %107 : vector<8x256xf32>
    %cst_71 = arith.constant 1.000000e+00 : f32
    %109 = vector.broadcast %cst_71 : f32 to vector<8x256xf32>
    %110 = arith.addf %109, %108 : vector<8x256xf32>
    %cst_72 = arith.constant 1.000000e+00 : f32
    %111 = vector.broadcast %cst_72 : f32 to vector<8x256xf32>
    %112 = arith.divf %111, %110 : vector<8x256xf32>
    %cst_73 = arith.constant 0.000000e+00 : f32
    %113 = vector.broadcast %cst_73 : f32 to vector<8x256xf32>
    %114 = arith.cmpf oge, %104, %113 : vector<8x256xf32>
    %115 = arith.mulf %108, %112 : vector<8x256xf32>
    %116 = arith.select %114, %112, %115 : vector<8x256xi1>, vector<8x256xf32>
    %c16_i32 = arith.constant 16 : i32
    %117 = vector.broadcast %c16_i32 : i32 to vector<8x256xi32>
    %118 = arith.cmpi slt, %3, %117 : vector<8x256xi32>
    %119 = arith.select %118, %116, %50 : vector<8x256xi1>, vector<8x256xf32>
    %c0_74 = arith.constant 0 : index
    %c0_75 = arith.constant 0 : index
    %120 = vector.load %arg4[%c0_74, %c0_75] : memref<8x256xf32, #tpu.memory_space<vmem>>, vector<8x256xf32>
    tpu.vector_store %arg4[%c0_74, %c0_75], %119 {strides = array<i32>} : memref<8x256xf32, #tpu.memory_space<vmem>>, vector<8x256xf32>,
    return
  }
  func.func @transform_0(%arg0: i32) -> (i32, i32) {
    %c0_i32 = arith.constant 0 : i32
    %c0_i32_0 = arith.constant 0 : i32
    return %arg0, %c0_i32 : i32, i32
  }
  func.func @transform_1(%arg0: i32) -> (i32, i32, i32) {
    %c0_i32 = arith.constant 0 : i32
    %c0_i32_0 = arith.constant 0 : i32
    %c0_i32_1 = arith.constant 0 : i32
    %c0_i32_2 = arith.constant 0 : i32
    return %c0_i32, %c0_i32_0, %c0_i32_1 : i32, i32, i32
  }
  func.func @transform_2(%arg0: i32) -> (i32, i32, i32) {
    %c0_i32 = arith.constant 0 : i32
    %c0_i32_0 = arith.constant 0 : i32
    %c0_i32_1 = arith.constant 0 : i32
    %c0_i32_2 = arith.constant 0 : i32
    return %c0_i32, %c0_i32_0, %c0_i32_1 : i32, i32, i32
  }
  func.func @transform_3(%arg0: i32) -> (i32, i32) {
    %c0_i32 = arith.constant 0 : i32
    %c0_i32_0 = arith.constant 0 : i32
    return %arg0, %c0_i32 : i32, i32
  }
}

</mosaic_0001>

<bundles_post_ra>
// kernel: vae_eft_forward.1
= control target key start
LH: loop header
LB: loop body
LE: loop exit
PB: predicated region body
PF: predicated region fallthrough
CT: control target
= control target key end

     0   :  { %8 = vsyncpa [#allocation3], 0  ;;  %s2440_s0 = inlined_call_operand.vmem [shape: f32[8,256], index: 0, kind: input, shape index: {}]   ;;  %s2441_s1 = inlined_call_operand.hbm [shape: f32[10,256,256], index: 1, kind: input, shape index: {}]   ;;  %s2442_s2 = inlined_call_operand.hbm [shape: f32[10,1,256], index: 2, kind: input, shape index: {}]   ;;  %s2443_s3 = inlined_call_operand.vmem [shape: f32[8,256], index: 3, kind: output, shape index: {}]  }
   0x1   :  { %9 = vsyncpa [#allocation5], 0  ;;  %s2321_s12 = smov [#allocation2]   ;;  %s2273_s16 = scalar_lea.hbm %s2441_s1, 81920 }
   0x2   :  { %s17_s13 = sshll.u32 %s2321_s12, 4  ;;  %p2274_p0 = scmp.ne.s32.totalorder %s2441_s1, %s2273_s16  ;;  %s18_s13 = int_to_ptr.vmem [resolvable:$true] %s17_s13 }
   0x3   :  { %p2277_p1 = scmp.lt.u32.totalorder %s2273_s16, %s2441_s1 }
   0x5   :  { %p2279_p2 = pnand %p2277_p1, %p2274_p0 }
   0x7   :  { %2282 = shalt.err (!%p2279_p2)
}
   0x8   :  { %s2283_s21 = scalar_lea.vmem %s18_s13, 81920  ;;  %p2288_p4 = scmp.lt.s32.totalorder %s18_s13, %s18_s13 }
   0x9   :  { %p2284_p3 = scmp.ne.s32.totalorder %s18_s13, %s2283_s21  ;;  %p2289_p5 = scmp.lt.s32.totalorder %s2283_s21, %s2283_s21 }
   0xb   :  { %p2290_p6 = por %p2289_p5, %p2288_p4 }
   0xd   :  { %p2291_p7 = pnand %p2290_p6, %p2284_p3 }
   0xf   :  { %2294 = shalt.err (!%p2291_p7)
}
  0x10   :  { %s2322_s22 = smov 256   ;;  %s2323_s23 = smov 16  }
  0x11   :  { %23 = dma.hbm_to_vmem [thread:$0]  %s2441_s1, 81920, %s18_s13, [#allocation3], %s2322_s22, %s2322_s22, %s2323_s23  }
  0x12   :  { %s2324_s26 = smov [#allocation4]   ;;  %s2295_s30 = scalar_lea.hbm %s2442_s2, 320 }
  0x13   :  { %s29_s27 = sshll.u32 %s2324_s26, 4  ;;  %p2296_p8 = scmp.ne.s32.totalorder %s2442_s2, %s2295_s30  ;;  %s30_s27 = int_to_ptr.vmem [resolvable:$true] %s29_s27 }
  0x14   :  { %p2299_p9 = scmp.lt.u32.totalorder %s2295_s30, %s2442_s2 }
  0x16   :  { %p2301_p10 = pnand %p2299_p9, %p2296_p8 }
  0x18   :  { %2304 = shalt.err (!%p2301_p10)
}
  0x19   :  { %s2305_s8 = scalar_lea.vmem %s30_s27, 320  ;;  %p2310_p12 = scmp.lt.s32.totalorder %s30_s27, %s30_s27 }
  0x1a   :  { %p2306_p11 = scmp.ne.s32.totalorder %s30_s27, %s2305_s8  ;;  %p2311_p13 = scmp.lt.s32.totalorder %s2305_s8, %s2305_s8 }
  0x1c   :  { %p2312_p0 = por %p2311_p13, %p2310_p12 }
  0x1e   :  { %p2313_p1 = pnand %p2312_p0, %p2306_p11 }
  0x20   :  { %2316 = shalt.err (!%p2313_p1)
}
  0x21   :  { %s2325_s1 = smov 32   ;;  %s2326_s9 = smov 2  }
  0x22   :  { %35 = dma.hbm_to_vmem [thread:$0]  %s2442_s2, 320, %s30_s27, [#allocation5], %s2325_s1, %s2325_s1, %s2326_s9  }
  0x23   :  { %2317 = dma.done.wait [#allocation3], 81920  }
  0x24   :  { %2318 = vsyncadd [#allocation3], 4294885376 }
  0x25   :  { %2319 = dma.done.wait [#allocation5], 320  }
  0x26   :  { %2320 = vsyncadd [#allocation5], 4294966976  ;;  %v50_v0 = vld [vmem:[#allocation2 + $0x8] sm:$0xff]  ;;  %v52_v1 = vld [vmem:[#allocation2 + $0x18] sm:$0xff] }
  0x27   :  { %v49_v2 = vld [vmem:[#allocation2] sm:$0xff]  ;;  %v1613_v3 = vpack.c.bf16 %v52_v1, %v50_v0  ;;  %v51_v4 = vld [vmem:[#allocation2 + $0x10] sm:$0xff]  ;;  %v54_v5 = vld [vmem:[#allocation2 + $0x28] sm:$0xff] }
  0x28   :  { %v56_v6 = vld [vmem:[#allocation2 + $0x38] sm:$0xff]  ;;  %v1615_v7 = vpack.c.bf16 %v51_v4, %v49_v2  ;;  %v53_v9 = vld [vmem:[#allocation2 + $0x20] sm:$0xff]  ;;  %v55_v10 = vld [vmem:[#allocation2 + $0x30] sm:$0xff] }
  0x29   :  { %v1617_v8 = vpack.c.bf16 %v56_v6, %v54_v5  ;;  %v58_v11 = vld [vmem:[#allocation2 + $0x48] sm:$0xff]  ;;  %1614 = vmatprep.subr.bf16.mxu0 %v1613_v3  ;;  %v60_v12 = vld [vmem:[#allocation2 + $0x58] sm:$0xff]  ;;  %v1619_v13 = vpack.c.bf16 %v55_v10, %v53_v9  ;;  %v57_v15 = vld [vmem:[#allocation2 + $0x40] sm:$0xff] }
  0x2a   :  { %1616 = vmatpush1.bf16.msra.mxu0 %v1615_v7  ;;  %v1621_v14 = vpack.c.bf16 %v60_v12, %v58_v11  ;;  %v59_v16 = vld [vmem:[#allocation2 + $0x50] sm:$0xff]  ;;  %v62_v17 = vld [vmem:[#allocation2 + $0x68] sm:$0xff]  ;;  %v64_v18 = vld [vmem:[#allocation2 + $0x78] sm:$0xff] }
  0x2b   :  { %1618 = vmatprep.subr.bf16.mxu0 %v1617_v8  ;;  %v1623_v19 = vpack.c.bf16 %v59_v16, %v57_v15  ;;  %v1625_v20 = vpack.c.bf16 %v64_v18, %v62_v17  ;;  %v61_v21 = vld [vmem:[#allocation2 + $0x60] sm:$0xff]  ;;  %v63_v22 = vld [vmem:[#allocation2 + $0x70] sm:$0xff]  ;;  %v66_v23 = vld [vmem:[#allocation2 + $0x88] sm:$0xff] }
  0x2c   :  { %v68_v24 = vld [vmem:[#allocation2 + $0x98] sm:$0xff]  ;;  %v1627_v25 = vpack.c.bf16 %v63_v22, %v61_v21  ;;  %v65_v27 = vld [vmem:[#allocation2 + $0x80] sm:$0xff]  ;;  %v67_v28 = vld [vmem:[#allocation2 + $0x90] sm:$0xff] }
  0x2d   :  { %v1629_v26 = vpack.c.bf16 %v68_v24, %v66_v23  ;;  %v70_v29 = vld [vmem:[#allocation2 + $0xa8] sm:$0xff]  ;;  %v72_v30 = vld [vmem:[#allocation2 + $0xb8] sm:$0xff]  ;;  %v1631_v31 = vpack.c.bf16 %v67_v28, %v65_v27  ;;  %v69_v33 = vld [vmem:[#allocation2 + $0xa0] sm:$0xff] }
  0x2e   :  { %1620 = vmatpush1.bf16.msra.mxu0 %v1619_v13  ;;  %v1633_v32 = vpack.c.bf16 %v72_v30, %v70_v29  ;;  %v71_v34 = vld [vmem:[#allocation2 + $0xb0] sm:$0xff]  ;;  %v74_v35 = vld [vmem:[#allocation2 + $0xc8] sm:$0xff]  ;;  %v76_v36 = vld [vmem:[#allocation2 + $0xd8] sm:$0xff] }
  0x2f   :  { %1622 = vmatprep.subr.bf16.mxu0 %v1621_v14  ;;  %v1635_v37 = vpack.c.bf16 %v71_v34, %v69_v33  ;;  %v73_v38 = vld [vmem:[#allocation2 + $0xc0] sm:$0xff]  ;;  %v75_v39 = vld [vmem:[#allocation2 + $0xd0] sm:$0xff]  ;;  %v1637_v40 = vpack.c.bf16 %v76_v36, %v74_v35  ;;  %v78_v41 = vld [vmem:[#allocation2 + $0xe8] sm:$0xff] }
  0x30   :  { %v80_v42 = vld [vmem:[#allocation2 + $0xf8] sm:$0xff]  ;;  %v43_v43 = vld [vmem:[%s2440_s0 + $0x8] sm:$0xff]  ;;  %v201_v46 = vld [vmem:[#allocation2 + $0x200] sm:$0xff]  ;;  %v1639_v51 = vpack.c.bf16 %v75_v39, %v73_v38 }
  0x31   :  { %189 = vmatprep.mubr.f32.mxu0 %v43_v43  ;;  %v202_v44 = vld [vmem:[#allocation2 + $0x208] sm:$0xff]  ;;  %v204_v45 = vld [vmem:[#allocation2 + $0x218] sm:$0xff]  ;;  %v203_v48 = vld [vmem:[#allocation2 + $0x210] sm:$0xff]  ;;  %v1641_v57 = vpack.c.bf16 %v80_v42, %v78_v41 }
  0x32   :  { %1624 = vmatpush1.bf16.msra.mxu0 %v1623_v19  ;;  %v1677_v47 = vpack.c.bf16 %v204_v45, %v202_v44  ;;  %v206_v49 = vld [vmem:[#allocation2 + $0x228] sm:$0xff]  ;;  %v208_v50 = vld [vmem:[#allocation2 + $0x238] sm:$0xff]  ;;  %v1679_v52 = vpack.c.bf16 %v203_v48, %v201_v46  ;;  %v205_v54 = vld [vmem:[#allocation2 + $0x220] sm:$0xff] }
  0x33   :  { %1626 = vmatprep.subr.bf16.mxu0 %v1625_v20  ;;  %v1681_v53 = vpack.c.bf16 %v208_v50, %v206_v49  ;;  %v207_v55 = vld [vmem:[#allocation2 + $0x230] sm:$0xff]  ;;  %v210_v56 = vld [vmem:[#allocation2 + $0x248] sm:$0xff]  ;;  %v77_v58 = vld [vmem:[#allocation2 + $0xe0] sm:$0xff] }
  0x34   :  { %v79_v59 = vld [vmem:[#allocation2 + $0xf0] sm:$0xff]  ;;  %1678 = vmatprep.subr.bf16.mxu1 %v1677_v47  ;;  %v212_v60 = vld [vmem:[#allocation2 + $0x258] sm:$0xff]  ;;  %v82_v61 = vld [vmem:[#allocation2 + $0x108] sm:$0xff]  ;;  %v1683_v63 = vpack.c.bf16 %v207_v55, %v205_v54 }
  0x35   :  { %v84_v62 = vld [vmem:[#allocation2 + $0x118] sm:$0xff]  ;;  %1680 = vmatpush1.bf16.msra.mxu1 %v1679_v52  ;;  %v1685_v0 = vpack.c.bf16 %v212_v60, %v210_v56  ;;  %v209_v1 = vld [vmem:[#allocation2 + $0x240] sm:$0xff]  ;;  %v211_v2 = vld [vmem:[#allocation2 + $0x250] sm:$0xff]  ;;  %v1643_v3 = vpack.c.bf16 %v79_v59, %v77_v58 }
  0x36   :  { %1628 = vmatpush1.bf16.msra.mxu0 %v1627_v25  ;;  %1682 = vmatprep.subr.bf16.mxu1 %v1681_v53  ;;  %v214_v4 = vld [vmem:[#allocation2 + $0x268] sm:$0xff]  ;;  %v216_v5 = vld [vmem:[#allocation2 + $0x278] sm:$0xff]  ;;  %v1645_v6 = vpack.c.bf16 %v84_v62, %v82_v61  ;;  %v81_v7 = vld [vmem:[#allocation2 + $0x100] sm:$0xff]  ;;  %v1687_v11 = vpack.c.bf16 %v211_v2, %v209_v1 }
  0x37   :  { %1630 = vmatprep.subr.bf16.mxu0 %v1629_v26  ;;  %v83_v8 = vld [vmem:[#allocation2 + $0x110] sm:$0xff]  ;;  %v86_v9 = vld [vmem:[#allocation2 + $0x128] sm:$0xff]  ;;  %v88_v10 = vld [vmem:[#allocation2 + $0x138] sm:$0xff]  ;;  %v1689_v12 = vpack.c.bf16 %v216_v5, %v214_v4 }
  0x38   :  { %v213_v13 = vld [vmem:[#allocation2 + $0x260] sm:$0xff]  ;;  %v215_v14 = vld [vmem:[#allocation2 + $0x270] sm:$0xff]  ;;  %v1647_v15 = vpack.c.bf16 %v83_v8, %v81_v7  ;;  %v218_v16 = vld [vmem:[#allocation2 + $0x288] sm:$0xff]  ;;  %v1649_v18 = vpack.c.bf16 %v88_v10, %v86_v9 }
  0x39   :  { %1684 = vmatpush1.bf16.msra.mxu1 %v1683_v63  ;;  %v220_v17 = vld [vmem:[#allocation2 + $0x298] sm:$0xff]  ;;  %v85_v19 = vld [vmem:[#allocation2 + $0x120] sm:$0xff]  ;;  %v87_v20 = vld [vmem:[#allocation2 + $0x130] sm:$0xff]  ;;  %v1691_v23 = vpack.c.bf16 %v215_v14, %v213_v13 }
  0x3a   :  { %1632 = vmatpush1.bf16.msra.mxu0 %v1631_v31  ;;  %1686 = vmatprep.subr.bf16.mxu1 %v1685_v0  ;;  %v90_v21 = vld [vmem:[#allocation2 + $0x148] sm:$0xff]  ;;  %v92_v22 = vld [vmem:[#allocation2 + $0x158] sm:$0xff]  ;;  %v1693_v24 = vpack.c.bf16 %v220_v17, %v218_v16  ;;  %v217_v25 = vld [vmem:[#allocation2 + $0x280] sm:$0xff]  ;;  %v1651_v27 = vpack.c.bf16 %v87_v20, %v85_v19 }
  0x3b   :  { %1634 = vmatprep.subr.bf16.mxu0 %v1633_v32  ;;  %v219_v26 = vld [vmem:[#allocation2 + $0x290] sm:$0xff]  ;;  %v222_v28 = vld [vmem:[#allocation2 + $0x2a8] sm:$0xff]  ;;  %v224_v29 = vld [vmem:[#allocation2 + $0x2b8] sm:$0xff]  ;;  %v1653_v30 = vpack.c.bf16 %v92_v22, %v90_v21 }
  0x3c   :  { %v89_v31 = vld [vmem:[#allocation2 + $0x140] sm:$0xff]  ;;  %v91_v32 = vld [vmem:[#allocation2 + $0x150] sm:$0xff]  ;;  %v94_v33 = vld [vmem:[#allocation2 + $0x168] sm:$0xff]  ;;  %v1695_v35 = vpack.c.bf16 %v219_v26, %v217_v25  ;;  %v1697_v36 = vpack.c.bf16 %v224_v29, %v222_v28 }
  0x3d   :  { %1688 = vmatpush1.bf16.msra.mxu1 %v1687_v11  ;;  %v96_v34 = vld [vmem:[#allocation2 + $0x178] sm:$0xff]  ;;  %v223_v38 = vld [vmem:[#allocation2 + $0x2b0] sm:$0xff]  ;;  %v1655_v39 = vpack.c.bf16 %v91_v32, %v89_v31  ;;  %v93_v43 = vld [vmem:[#allocation2 + $0x160] sm:$0xff] }
  0x3e   :  { %1636 = vmatpush1.bf16.msra.mxu0 %v1635_v37  ;;  %1690 = vmatprep.subr.bf16.mxu1 %v1689_v12  ;;  %v221_v37 = vld [vmem:[#allocation2 + $0x2a0] sm:$0xff]  ;;  %v228_v41 = vld [vmem:[#allocation2 + $0x2d8] sm:$0xff]  ;;  %v1657_v42 = vpack.c.bf16 %v96_v34, %v94_v33  ;;  %v95_v44 = vld [vmem:[#allocation2 + $0x170] sm:$0xff] }
  0x3f   :  { %1638 = vmatprep.subr.bf16.mxu0 %v1637_v40  ;;  %v226_v40 = vld [vmem:[#allocation2 + $0x2c8] sm:$0xff]  ;;  %v100_v46 = vld [vmem:[#allocation2 + $0x198] sm:$0xff]  ;;  %v1699_v47 = vpack.c.bf16 %v223_v38, %v221_v37  ;;  %v225_v49 = vld [vmem:[#allocation2 + $0x2c0] sm:$0xff] }
  0x40   :  { %v98_v45 = vld [vmem:[#allocation2 + $0x188] sm:$0xff]  ;;  %v1701_v48 = vpack.c.bf16 %v228_v41, %v226_v40  ;;  %v227_v50 = vld [vmem:[#allocation2 + $0x2d0] sm:$0xff]  ;;  %v232_v53 = vld [vmem:[#allocation2 + $0x2f8] sm:$0xff] }
  0x41   :  { %1692 = vmatpush1.bf16.msra.mxu1 %v1691_v23  ;;  %v230_v52 = vld [vmem:[#allocation2 + $0x2e8] sm:$0xff]  ;;  %v1661_v54 = vpack.c.bf16 %v100_v46, %v98_v45  ;;  %v97_v55 = vld [vmem:[#allocation2 + $0x180] sm:$0xff]  ;;  %v99_v56 = vld [vmem:[#allocation2 + $0x190] sm:$0xff]  ;;  %v1703_v59 = vpack.c.bf16 %v227_v50, %v225_v49 }
  0x42   :  { %1640 = vmatpush1.bf16.msra.mxu0 %v1639_v51  ;;  %1694 = vmatprep.subr.bf16.mxu1 %v1693_v24  ;;  %v1659_v51 = vpack.c.bf16 %v95_v44, %v93_v43  ;;  %v104_v58 = vld [vmem:[#allocation2 + $0x1b8] sm:$0xff]  ;;  %v1705_v60 = vpack.c.bf16 %v232_v53, %v230_v52  ;;  %v229_v61 = vld [vmem:[#allocation2 + $0x2e0] sm:$0xff]  ;;  %v231_v62 = vld [vmem:[#allocation2 + $0x2f0] sm:$0xff]  ;;  %v1663_v63 = vpack.c.bf16 %v99_v56, %v97_v55 }
  0x43   :  { %1642 = vmatprep.subr.bf16.mxu0 %v1641_v57  ;;  %v102_v57 = vld [vmem:[#allocation2 + $0x1a8] sm:$0xff]  ;;  %v236_v1 = vld [vmem:[#allocation2 + $0x318] sm:$0xff]  ;;  %v103_v4 = vld [vmem:[#allocation2 + $0x1b0] sm:$0xff]  ;;  %v1707_v7 = vpack.c.bf16 %v231_v62, %v229_v61 }
  0x44   :  { %v234_v0 = vld [vmem:[#allocation2 + $0x308] sm:$0xff]  ;;  %v1665_v2 = vpack.c.bf16 %v104_v58, %v102_v57  ;;  %v233_v9 = vld [vmem:[#allocation2 + $0x300] sm:$0xff]  ;;  %v235_v10 = vld [vmem:[#allocation2 + $0x310] sm:$0xff] }
  0x45   :  { %1696 = vmatpush1.bf16.msra.mxu1 %v1695_v35  ;;  %v106_v5 = vld [vmem:[#allocation2 + $0x1c8] sm:$0xff]  ;;  %v1709_v8 = vpack.c.bf16 %v236_v1, %v234_v0  ;;  %v240_v13 = vld [vmem:[#allocation2 + $0x338] sm:$0xff]  ;;  %v107_v16 = vld [vmem:[#allocation2 + $0x1d0] sm:$0xff]  ;;  %v1711_v19 = vpack.c.bf16 %v235_v10, %v233_v9 }
  0x46   :  { %1644 = vmatpush1.bf16.msra.mxu0 %v1643_v3  ;;  %1698 = vmatprep.subr.bf16.mxu1 %v1697_v36  ;;  %v101_v3 = vld [vmem:[#allocation2 + $0x1a0] sm:$0xff]  ;;  %v238_v12 = vld [vmem:[#allocation2 + $0x328] sm:$0xff]  ;;  %v239_v22 = vld [vmem:[#allocation2 + $0x330] sm:$0xff] }
  0x47   :  { %1646 = vmatprep.subr.bf16.mxu0 %v1645_v6  ;;  %v108_v6 = vld [vmem:[#allocation2 + $0x1d8] sm:$0xff]  ;;  %v1667_v11 = vpack.c.bf16 %v103_v4, %v101_v3  ;;  %v110_v17 = vld [vmem:[#allocation2 + $0x1e8] sm:$0xff]  ;;  %v1713_v20 = vpack.c.bf16 %v240_v13, %v238_v12  ;;  %v237_v21 = vld [vmem:[#allocation2 + $0x320] sm:$0xff] }
  0x48   :  { %v1669_v14 = vpack.c.bf16 %v108_v6, %v106_v5  ;;  %v242_v24 = vld [vmem:[#allocation2 + $0x348] sm:$0xff]  ;;  %v244_v25 = vld [vmem:[#allocation2 + $0x358] sm:$0xff]  ;;  %v111_v28 = vld [vmem:[#allocation2 + $0x1f0] sm:$0xff]  ;;  %v1715_v29 = vpack.c.bf16 %v239_v22, %v237_v21 }
  0x49   :  { %1700 = vmatpush1.bf16.msra.mxu1 %v1699_v47  ;;  %v241_v31 = vld [vmem:[#allocation2 + $0x340] sm:$0xff]  ;;  %v243_v32 = vld [vmem:[#allocation2 + $0x350] sm:$0xff]  ;;  %v246_v34 = vld [vmem:[#allocation2 + $0x368] sm:$0xff] }
  0x4a   :  { %1648 = vmatpush1.bf16.msra.mxu0 %v1647_v15  ;;  %1702 = vmatprep.subr.bf16.mxu1 %v1701_v48  ;;  %v105_v15 = vld [vmem:[#allocation2 + $0x1c0] sm:$0xff]  ;;  %v248_v35 = vld [vmem:[#allocation2 + $0x378] sm:$0xff]  ;;  %v1719_v36 = vpack.c.bf16 %v243_v32, %v241_v31  ;;  %v250_v41 = vld [vmem:[#allocation2 + $0x388] sm:$0xff] }
  0x4b   :  { %1650 = vmatprep.subr.bf16.mxu0 %v1649_v18  ;;  %v112_v18 = vld [vmem:[#allocation2 + $0x1f8] sm:$0xff]  ;;  %v1671_v23 = vpack.c.bf16 %v107_v16, %v105_v15  ;;  %v1721_v37 = vpack.c.bf16 %v248_v35, %v246_v34  ;;  %v245_v38 = vld [vmem:[#allocation2 + $0x360] sm:$0xff]  ;;  %v251_v46 = vld [vmem:[#allocation2 + $0x390] sm:$0xff] }
  0x4c   :  { %v1673_v26 = vpack.c.bf16 %v112_v18, %v110_v17  ;;  %v42_v40 = vld [vmem:[%s2440_s0] sm:$0xff]  ;;  %v254_v47 = vld [vmem:[#allocation2 + $0x3a8] sm:$0xff]  ;;  %v256_v48 = vld [vmem:[#allocation2 + $0x3b8] sm:$0xff] }
  0x4d   :  { %1704 = vmatpush1.bf16.msra.mxu1 %v1703_v59  ;;  %v249_v45 = vld [vmem:[#allocation2 + $0x380] sm:$0xff]  ;;  %v1729_v50 = vpack.c.bf16 %v256_v48, %v254_v47  ;;  %v255_v52 = vld [vmem:[#allocation2 + $0x3b0] sm:$0xff]  ;;  %v260_v55 = vld [vmem:[#allocation2 + $0x3d8] sm:$0xff] }
  0x4e   :  { %1652 = vmatpush1.bf16.msra.mxu0 %v1651_v27  ;;  %1706 = vmatprep.subr.bf16.mxu1 %v1705_v60  ;;  %v109_v27 = vld [vmem:[#allocation2 + $0x1e0] sm:$0xff]  ;;  %v1727_v49 = vpack.c.bf16 %v251_v46, %v249_v45  ;;  %v259_v58 = vld [vmem:[#allocation2 + $0x3d0] sm:$0xff]  ;;  %v262_v60 = vld [vmem:[#allocation2 + $0x3e8] sm:$0xff] }
  0x4f   :  { %1654 = vmatprep.subr.bf16.mxu0 %v1653_v30  ;;  %v1717_v30 = vpack.c.bf16 %v244_v25, %v242_v24  ;;  %v1675_v33 = vpack.c.bf16 %v111_v28, %v109_v27  ;;  %v257_v57 = vld [vmem:[#allocation2 + $0x3c0] sm:$0xff]  ;;  %v264_v61 = vld [vmem:[#allocation2 + $0x3f8] sm:$0xff]  ;;  %v263_v0 = vld [vmem:[#allocation2 + $0x3f0] sm:$0xff] }
  0x50   :  { %v1735_v59 = vpack.c.bf16 %v259_v58, %v257_v57  ;;  %v1737_v62 = vpack.c.bf16 %v264_v61, %v262_v60  ;;  %v357_v3 = vld [vmem:[#allocation2 + $0x418] sm:$0xff]  ;;  %v354_v4 = vld [vmem:[#allocation2 + $0x400] sm:$0xff]  ;;  %v356_v6 = vld [vmem:[#allocation2 + $0x410] sm:$0xff] }
  0x51   :  { %1708 = vmatpush1.bf16.msra.mxu1 %v1707_v7  ;;  %v359_v7 = vld [vmem:[#allocation2 + $0x428] sm:$0xff]  ;;  %v1743_v9 = vpack.c.bf16 %v356_v6, %v354_v4  ;;  %v360_v12 = vld [vmem:[#allocation2 + $0x430] sm:$0xff]  ;;  %v362_v17 = vld [vmem:[#allocation2 + $0x440] sm:$0xff] }
  0x52   :  { %1656 = vmatpush1.bf16.msra.mxu0 %v1655_v39  ;;  %1710 = vmatprep.subr.bf16.mxu1 %v1709_v8  ;;  %v247_v39 = vld [vmem:[#allocation2 + $0x370] sm:$0xff]  ;;  %v361_v8 = vld [vmem:[#allocation2 + $0x438] sm:$0xff]  ;;  %v363_v13 = vld [vmem:[#allocation2 + $0x448] sm:$0xff] }
  0x53   :  { %1658 = vmatprep.subr.bf16.mxu0 %v1657_v42  ;;  %v252_v42 = vld [vmem:[#allocation2 + $0x398] sm:$0xff]  ;;  %v1723_v43 = vpack.c.bf16 %v247_v39, %v245_v38  ;;  %v1745_v10 = vpack.c.bf16 %v361_v8, %v359_v7  ;;  %v364_v18 = vld [vmem:[#allocation2 + $0x450] sm:$0xff]  ;;  %v371_v25 = vld [vmem:[#allocation2 + $0x488] sm:$0xff] }
  0x54   :  { %v1725_v44 = vpack.c.bf16 %v252_v42, %v250_v41  ;;  %v1751_v21 = vpack.c.bf16 %v364_v18, %v362_v17  ;;  %v368_v24 = vld [vmem:[#allocation2 + $0x470] sm:$0xff]  ;;  %v375_v31 = vld [vmem:[#allocation2 + $0x4a8] sm:$0xff]  ;;  %v377_v32 = vld [vmem:[#allocation2 + $0x4b8] sm:$0xff] }
  0x55   :  { %1712 = vmatpush1.bf16.msra.mxu1 %v1711_v19  ;;  %v367_v19 = vld [vmem:[#allocation2 + $0x468] sm:$0xff]  ;;  %v1761_v34 = vpack.c.bf16 %v377_v32, %v375_v31  ;;  %v374_v35 = vld [vmem:[#allocation2 + $0x4a0] sm:$0xff]  ;;  %v381_v38 = vld [vmem:[#allocation2 + $0x4d8] sm:$0xff] }
  0x56   :  { %1660 = vmatpush1.bf16.msra.mxu0 %v1659_v51  ;;  %1714 = vmatprep.subr.bf16.mxu1 %v1713_v20  ;;  %v253_v51 = vld [vmem:[#allocation2 + $0x3a0] sm:$0xff]  ;;  %v369_v20 = vld [vmem:[#allocation2 + $0x478] sm:$0xff]  ;;  %v380_v42 = vld [vmem:[#allocation2 + $0x4d0] sm:$0xff] }
  0x57   :  { %1662 = vmatprep.subr.bf16.mxu0 %v1661_v54  ;;  %v1731_v53 = vpack.c.bf16 %v255_v52, %v253_v51  ;;  %v258_v54 = vld [vmem:[#allocation2 + $0x3c8] sm:$0xff]  ;;  %v1753_v22 = vpack.c.bf16 %v369_v20, %v367_v19  ;;  %v378_v41 = vld [vmem:[#allocation2 + $0x4c0] sm:$0xff]  ;;  %v384_v48 = vld [vmem:[#allocation2 + $0x4f0] sm:$0xff] }
  0x58   :  { %v1733_v56 = vpack.c.bf16 %v260_v55, %v258_v54  ;;  %v1767_v45 = vpack.c.bf16 %v380_v42, %v378_v41  ;;  %v382_v47 = vld [vmem:[#allocation2 + $0x4e0] sm:$0xff]  ;;  %v388_v54 = vld [vmem:[#allocation2 + $0x510] sm:$0xff]  ;;  %v391_v55 = vld [vmem:[#allocation2 + $0x528] sm:$0xff] }
  0x59   :  { %1716 = vmatpush1.bf16.msra.mxu1 %v1715_v29  ;;  %v370_v29 = vld [vmem:[#allocation2 + $0x480] sm:$0xff]  ;;  %v1771_v51 = vpack.c.bf16 %v384_v48, %v382_v47  ;;  %v392_v60 = vld [vmem:[#allocation2 + $0x530] sm:$0xff]  ;;  %v395_v61 = vld [vmem:[#allocation2 + $0x548] sm:$0xff] }
  0x5a   :  { %1664 = vmatpush1.bf16.msra.mxu0 %v1663_v63  ;;  %1718 = vmatprep.subr.bf16.mxu1 %v1717_v30  ;;  %v261_v63 = vld [vmem:[#allocation2 + $0x3e0] sm:$0xff]  ;;  %v372_v30 = vld [vmem:[#allocation2 + $0x490] sm:$0xff]  ;;  %v401_v4 = vld [vmem:[#allocation2 + $0x578] sm:$0xff] }
  0x5b   :  { %1666 = vmatprep.subr.bf16.mxu0 %v1665_v2  ;;  %v1739_v1 = vpack.c.bf16 %v263_v0, %v261_v63  ;;  %v355_v2 = vld [vmem:[#allocation2 + $0x408] sm:$0xff]  ;;  %v398_v7 = vld [vmem:[#allocation2 + $0x560] sm:$0xff]  ;;  %v400_v8 = vld [vmem:[#allocation2 + $0x570] sm:$0xff] }
  0x5c   :  { %v1741_v5 = vpack.c.bf16 %v357_v3, %v355_v2  ;;  %v396_v2 = vld [vmem:[#allocation2 + $0x550] sm:$0xff]  ;;  %v399_v3 = vld [vmem:[#allocation2 + $0x568] sm:$0xff]  ;;  %v406_v19 = vld [vmem:[#allocation2 + $0x5a0] sm:$0xff] }
  0x5d   :  { %1720 = vmatpush1.bf16.msra.mxu1 %v1719_v36  ;;  %v376_v36 = vld [vmem:[#allocation2 + $0x4b0] sm:$0xff]  ;;  %v1785_v6 = vpack.c.bf16 %v401_v4, %v399_v3  ;;  %v522_v3 = vld [vmem:[#allocation2 + $0x678] sm:$0xff] }
  0x5e   :  { %1668 = vmatpush1.bf16.msra.mxu0 %v1667_v11  ;;  %1722 = vmatprep.subr.bf16.mxu1 %v1721_v37  ;;  %v358_v11 = vld [vmem:[#allocation2 + $0x420] sm:$0xff]  ;;  %v379_v37 = vld [vmem:[#allocation2 + $0x4c8] sm:$0xff]  ;;  %v1763_v39 = vpack.c.bf16 %v376_v36, %v374_v35  ;;  %v408_v20 = vld [vmem:[#allocation2 + $0x5b0] sm:$0xff] }
  0x5f   :  { %1670 = vmatprep.subr.bf16.mxu0 %v1669_v14  ;;  %v365_v14 = vld [vmem:[#allocation2 + $0x458] sm:$0xff]  ;;  %v1747_v15 = vpack.c.bf16 %v360_v12, %v358_v11  ;;  %v1787_v11 = vpack.c.bf16 %v400_v8, %v398_v7  ;;  %v412_v41 = vld [vmem:[#allocation2 + $0x5d0] sm:$0xff]  ;;  %v524_v8 = vld [vmem:[#allocation2 + $0x688] sm:$0xff] }
  0x60   :  { %v1749_v16 = vpack.c.bf16 %v365_v14, %v363_v13  ;;  %v402_v13 = vld [vmem:[#allocation2 + $0x580] sm:$0xff]  ;;  %v404_v14 = vld [vmem:[#allocation2 + $0x590] sm:$0xff] }
  0x61   :  { %1724 = vmatpush1.bf16.msra.mxu1 %v1723_v43  ;;  %v383_v43 = vld [vmem:[#allocation2 + $0x4e8] sm:$0xff]  ;;  %v1791_v17 = vpack.c.bf16 %v404_v14, %v402_v13  ;;  %v416_v47 = vld [vmem:[#allocation2 + $0x5f0] sm:$0xff] }
  0x62   :  { %1672 = vmatpush1.bf16.msra.mxu0 %v1671_v23  ;;  %1726 = vmatprep.subr.bf16.mxu1 %v1725_v44  ;;  %v366_v23 = vld [vmem:[#allocation2 + $0x460] sm:$0xff]  ;;  %v385_v44 = vld [vmem:[#allocation2 + $0x4f8] sm:$0xff]  ;;  %v521_v7 = vld [vmem:[#allocation2 + $0x670] sm:$0xff] }
  0x63   :  { %1674 = vmatprep.subr.bf16.mxu0 %v1673_v26  ;;  %v373_v26 = vld [vmem:[#allocation2 + $0x498] sm:$0xff]  ;;  %v1755_v27 = vpack.c.bf16 %v368_v24, %v366_v23  ;;  %v1769_v46 = vpack.c.bf16 %v385_v44, %v383_v43  ;;  %v415_v43 = vld [vmem:[#allocation2 + $0x5e8] sm:$0xff]  ;;  %v525_v13 = vld [vmem:[#allocation2 + $0x690] sm:$0xff] }
  0x64   :  { %v1757_v28 = vpack.c.bf16 %v373_v26, %v371_v25  ;;  %v113_v25 = vld [vmem:[#allocation4] sm:$0x3]  ;;  %v417_v44 = vld [vmem:[#allocation2 + $0x5f8] sm:$0xff]  ;;  %v528_v14 = vld [vmem:[#allocation2 + $0x6a8] sm:$0xff] }
  0x65   :  { %1728 = vmatpush1.bf16.msra.mxu1 %v1727_v49  ;;  %v387_v49 = vld [vmem:[#allocation2 + $0x508] sm:$0xff] }
  0x66   :  { %1676 = vmatpush1.bf16.msra.mxu0 %v1675_v33  ;;  %1730 = vmatprep.subr.bf16.mxu1 %v1729_v50  ;;  %v1759_v33 = vpack.c.bf16 %v372_v30, %v370_v29  ;;  %v389_v50 = vld [vmem:[#allocation2 + $0x518] sm:$0xff] }
  0x67   :  { %1742 = vmatprep.subr.bf16.mxu0 %v1741_v5  ;;  %v1773_v52 = vpack.c.bf16 %v389_v50, %v387_v49  ;;  %v508_v49 = vld [vmem:[#allocation2 + $0x608] sm:$0xff]  ;;  %v510_v50 = vld [vmem:[#allocation2 + $0x618] sm:$0xff] }
  0x69   :  { %190 = vmatmul.mubr.f32.vlgmr.msra.gmra.mrb[0].mxu0 %v42_v40  ;;  %1732 = vmatpush1.bf16.msra.mxu1 %v1731_v53  ;;  %v1765_v40 = vpack.c.bf16 %v381_v38, %v379_v37  ;;  %v386_v53 = vld [vmem:[#allocation2 + $0x500] sm:$0xff]  ;;  %v411_v37 = vld [vmem:[#allocation2 + $0x5c8] sm:$0xff]  ;;  %v413_v38 = vld [vmem:[#allocation2 + $0x5d8] sm:$0xff] }
  0x6a   :  { %1734 = vmatprep.subr.bf16.mxu1 %v1733_v56  ;;  %1744 = vmatpush1.bf16.msra.mxu0 %v1743_v9  ;;  %v393_v56 = vld [vmem:[#allocation2 + $0x538] sm:$0xff]  ;;  %v1775_v57 = vpack.c.bf16 %v388_v54, %v386_v53  ;;  %v403_v9 = vld [vmem:[#allocation2 + $0x588] sm:$0xff]  ;;  %v509_v53 = vld [vmem:[#allocation2 + $0x610] sm:$0xff] }
  0x6b   :  { %1746 = vmatprep.subr.bf16.mxu0 %v1745_v10  ;;  %v1777_v58 = vpack.c.bf16 %v393_v56, %v391_v55  ;;  %v405_v10 = vld [vmem:[#allocation2 + $0x598] sm:$0xff]  ;;  %v512_v54 = vld [vmem:[#allocation2 + $0x628] sm:$0xff] }
  0x6c   :  { %v1789_v12 = vpack.c.bf16 %v405_v10, %v403_v9  ;;  %v514_v55 = vld [vmem:[#allocation2 + $0x638] sm:$0xff] }
  0x6d   :  { %1736 = vmatpush1.bf16.msra.mxu1 %v1735_v59  ;;  %v390_v59 = vld [vmem:[#allocation2 + $0x520] sm:$0xff]  ;;  %v526_v9 = vld [vmem:[#allocation2 + $0x698] sm:$0xff] }
  0x6e   :  { %1738 = vmatprep.subr.bf16.mxu1 %v1737_v62  ;;  %1748 = vmatpush1.bf16.msra.mxu0 %v1747_v15  ;;  %v397_v62 = vld [vmem:[#allocation2 + $0x558] sm:$0xff]  ;;  %v1779_v63 = vpack.c.bf16 %v392_v60, %v390_v59  ;;  %v407_v15 = vld [vmem:[#allocation2 + $0x5a8] sm:$0xff]  ;;  %v513_v59 = vld [vmem:[#allocation2 + $0x630] sm:$0xff] }
  0x6f   :  { %1750 = vmatprep.subr.bf16.mxu0 %v1749_v16  ;;  %v1781_v0 = vpack.c.bf16 %v397_v62, %v395_v61  ;;  %v409_v16 = vld [vmem:[#allocation2 + $0x5b8] sm:$0xff]  ;;  %v516_v60 = vld [vmem:[#allocation2 + $0x648] sm:$0xff] }
  0x70   :  { %v1793_v18 = vpack.c.bf16 %v409_v16, %v407_v15  ;;  %v518_v61 = vld [vmem:[#allocation2 + $0x658] sm:$0xff] }
  0x71   :  { %1740 = vmatpush1.bf16.msra.mxu1 %v1739_v1  ;;  %v394_v1 = vld [vmem:[#allocation2 + $0x540] sm:$0xff]  ;;  %v530_v15 = vld [vmem:[#allocation2 + $0x6b8] sm:$0xff] }
  0x72   :  { %1752 = vmatpush1.bf16.msra.mxu0 %v1751_v21  ;;  %v1783_v5 = vpack.c.bf16 %v396_v2, %v394_v1  ;;  %v1795_v21 = vpack.c.bf16 %v408_v20, %v406_v19  ;;  %v517_v1 = vld [vmem:[#allocation2 + $0x650] sm:$0xff]  ;;  %v520_v2 = vld [vmem:[#allocation2 + $0x668] sm:$0xff] }
  0x73   :  { %1754 = vmatprep.subr.bf16.mxu0 %v1753_v22  ;;  %v44_v22 = vlaneseq  ;;  %v529_v19 = vld [vmem:[#allocation2 + $0x6b0] sm:$0xff]  ;;  %v532_v20 = vld [vmem:[#allocation2 + $0x6c8] sm:$0xff] }
  0x75   :  { %v116_v23 = vshrl.u32 %v44_v22, 7 }
  0x76   :  { %1756 = vmatpush1.bf16.msra.mxu0 %v1755_v27 }
  0x77   :  { %1758 = vmatprep.subr.bf16.mxu0 %v1757_v28  ;;  %v2378_v24 = vsub.s32 0, %v116_v23  ;;  %v2380_v26 = vsub.s32 1, %v116_v23 }
  0x79   :  { %v118_v27 = vrot.slane %v113_v25, %v2378_v24  ;;  %v122_v28 = vrot.slane %v113_v25, %v2380_v26 }
  0x7a   :  { %1760 = vmatpush1.bf16.msra.mxu0 %v1759_v33 }
  0x7b   :  { %1762 = vmatprep.subr.bf16.mxu0 %v1761_v34 }
  0x7e   :  { %1764 = vmatpush1.bf16.msra.mxu0 %v1763_v39  ;;  %v1797_v39 = vpack.c.bf16 %v413_v38, %v411_v37 }
  0x7f   :  { %1766 = vmatprep.subr.bf16.mxu0 %v1765_v40  ;;  %v410_v40 = vld [vmem:[#allocation2 + $0x5c0] sm:$0xff] }
  0x80   :  { %v1799_v42 = vpack.c.bf16 %v412_v41, %v410_v40  ;;  %v541_v40 = vld [vmem:[#allocation2 + $0x710] sm:$0xff]  ;;  %v544_v41 = vld [vmem:[#allocation2 + $0x728] sm:$0xff] }
  0x82   :  { %1768 = vmatpush1.bf16.msra.mxu0 %v1767_v45  ;;  %v1801_v45 = vpack.c.bf16 %v417_v44, %v415_v43 }
  0x83   :  { %1770 = vmatprep.subr.bf16.mxu0 %v1769_v46  ;;  %v414_v46 = vld [vmem:[#allocation2 + $0x5e0] sm:$0xff] }
  0x84   :  { %v1803_v48 = vpack.c.bf16 %v416_v47, %v414_v46  ;;  %v545_v46 = vld [vmem:[#allocation2 + $0x730] sm:$0xff]  ;;  %v548_v47 = vld [vmem:[#allocation2 + $0x748] sm:$0xff] }
  0x86   :  { %1772 = vmatpush1.bf16.msra.mxu0 %v1771_v51  ;;  %v507_v51 = vld [vmem:[#allocation2 + $0x600] sm:$0xff] }
  0x87   :  { %1774 = vmatprep.subr.bf16.mxu0 %v1773_v52  ;;  %v1805_v52 = vpack.c.bf16 %v510_v50, %v508_v49  ;;  %v1807_v56 = vpack.c.bf16 %v509_v53, %v507_v51  ;;  %v547_v51 = vld [vmem:[#allocation2 + $0x740] sm:$0xff]  ;;  %v552_v53 = vld [vmem:[#allocation2 + $0x768] sm:$0xff] }
  0x89   :  { %1806 = vmatprep.subr.bf16.mxu1 %v1805_v52  ;;  %v549_v52 = vld [vmem:[#allocation2 + $0x750] sm:$0xff] }
  0x8a   :  { %1776 = vmatpush1.bf16.msra.mxu0 %v1775_v57  ;;  %v1809_v57 = vpack.c.bf16 %v514_v55, %v512_v54  ;;  %v554_v54 = vld [vmem:[#allocation2 + $0x778] sm:$0xff]  ;;  %v1847_v55 = vpack.c.bf16 %v549_v52, %v547_v51  ;;  %v673_v51 = vld [vmem:[#allocation2 + $0x868] sm:$0xff] }
  0x8b   :  { %1778 = vmatprep.subr.bf16.mxu0 %v1777_v58  ;;  %v511_v58 = vld [vmem:[#allocation2 + $0x620] sm:$0xff]  ;;  %v675_v52 = vld [vmem:[#allocation2 + $0x878] sm:$0xff] }
  0x8c   :  { %v1811_v62 = vpack.c.bf16 %v513_v59, %v511_v58  ;;  %v553_v58 = vld [vmem:[#allocation2 + $0x770] sm:$0xff]  ;;  %v556_v59 = vld [vmem:[#allocation2 + $0x788] sm:$0xff] }
  0x8e   :  { %1780 = vmatpush1.bf16.msra.mxu0 %v1779_v63  ;;  %v1813_v63 = vpack.c.bf16 %v518_v61, %v516_v60  ;;  %v558_v60 = vld [vmem:[#allocation2 + $0x798] sm:$0xff] }
  0x8f   :  { %1782 = vmatprep.subr.bf16.mxu0 %v1781_v0  ;;  %v515_v0 = vld [vmem:[#allocation2 + $0x640] sm:$0xff] }
  0x90   :  { %v1815_v4 = vpack.c.bf16 %v517_v1, %v515_v0  ;;  %v557_v0 = vld [vmem:[#allocation2 + $0x790] sm:$0xff]  ;;  %v560_v1 = vld [vmem:[#allocation2 + $0x7a8] sm:$0xff] }
  0x92   :  { %1784 = vmatpush1.bf16.msra.mxu0 %v1783_v5  ;;  %v1817_v5 = vpack.c.bf16 %v522_v3, %v520_v2  ;;  %v562_v2 = vld [vmem:[#allocation2 + $0x7b8] sm:$0xff] }
  0x93   :  { %1786 = vmatprep.subr.bf16.mxu0 %v1785_v6  ;;  %v519_v6 = vld [vmem:[#allocation2 + $0x660] sm:$0xff] }
  0x94   :  { %v1819_v10 = vpack.c.bf16 %v521_v7, %v519_v6  ;;  %v561_v6 = vld [vmem:[#allocation2 + $0x7b0] sm:$0xff] }
  0x96   :  { %1788 = vmatpush1.bf16.msra.mxu0 %v1787_v11  ;;  %v1821_v11 = vpack.c.bf16 %v526_v9, %v524_v8  ;;  %v266_v8 = vld [vmem:[#allocation4 + $0x2] sm:$0x3] }
  0x97   :  { %1790 = vmatprep.subr.bf16.mxu0 %v1789_v12  ;;  %v523_v12 = vld [vmem:[#allocation2 + $0x680] sm:$0xff]  ;;  %v271_v9 = vrot.slane %v266_v8, %v2378_v24 }
  0x98   :  { %v1823_v16 = vpack.c.bf16 %v525_v13, %v523_v12 }
  0x9a   :  { %1792 = vmatpush1.bf16.msra.mxu0 %v1791_v17  ;;  %v1825_v17 = vpack.c.bf16 %v530_v15, %v528_v14 }
  0x9b   :  { %1794 = vmatprep.subr.bf16.mxu0 %v1793_v18  ;;  %v527_v18 = vld [vmem:[#allocation2 + $0x6a0] sm:$0xff] }
  0x9c   :  { %v1827_v23 = vpack.c.bf16 %v529_v19, %v527_v18  ;;  %v564_v19 = vld [vmem:[#allocation2 + $0x7c8] sm:$0xff] }
  0x9e   :  { %1796 = vmatpush1.bf16.msra.mxu0 %v1795_v21  ;;  %v534_v21 = vld [vmem:[#allocation2 + $0x6d8] sm:$0xff] }
  0x9f   :  { %1798 = vmatprep.subr.bf16.mxu0 %v1797_v39  ;;  %v1829_v25 = vpack.c.bf16 %v534_v21, %v532_v20  ;;  %v539_v39 = vld [vmem:[#allocation2 + $0x700] sm:$0xff]  ;;  %v566_v20 = vld [vmem:[#allocation2 + $0x7d8] sm:$0xff] }
  0xa0   :  { %v1839_v43 = vpack.c.bf16 %v541_v40, %v539_v39  ;;  %v1861_v21 = vpack.c.bf16 %v566_v20, %v564_v19  ;;  %v665_v39 = vld [vmem:[#allocation2 + $0x828] sm:$0xff]  ;;  %v667_v40 = vld [vmem:[#allocation2 + $0x838] sm:$0xff] }
  0xa2   :  { %1800 = vmatpush1.bf16.msra.mxu0 %v1799_v42  ;;  %v546_v42 = vld [vmem:[#allocation2 + $0x738] sm:$0xff] }
  0xa3   :  { %1802 = vmatprep.subr.bf16.mxu0 %v1801_v45  ;;  %v1841_v44 = vpack.c.bf16 %v546_v42, %v544_v41  ;;  %v543_v45 = vld [vmem:[#allocation2 + $0x720] sm:$0xff]  ;;  %v1873_v42 = vpack.c.bf16 %v667_v40, %v665_v39  ;;  %v707_v39 = vld [vmem:[#allocation2 + $0x978] sm:$0xff] }
  0xa4   :  { %v1843_v49 = vpack.c.bf16 %v545_v46, %v543_v45  ;;  %v669_v45 = vld [vmem:[#allocation2 + $0x848] sm:$0xff]  ;;  %v671_v46 = vld [vmem:[#allocation2 + $0x858] sm:$0xff] }
  0xa6   :  { %1804 = vmatpush1.bf16.msra.mxu0 %v1803_v48  ;;  %v550_v48 = vld [vmem:[#allocation2 + $0x758] sm:$0xff] }
  0xa7   :  { %v1845_v50 = vpack.c.bf16 %v550_v48, %v548_v47  ;;  %v1877_v48 = vpack.c.bf16 %v671_v46, %v669_v45  ;;  %v711_v45 = vld [vmem:[#allocation2 + $0x998] sm:$0xff] }
 0x13c   :  { %v191_v29 = vpop.f32.mrb[0].mxu0 }
 0x13d   :  { %v192_v30 = vadd.f32 %v191_v29, %v118_v27  ;;  %v193_v31 = vpop.f32.mrb[1].mxu0  ;;  %v531_v27 = vld [vmem:[#allocation2 + $0x6c0] sm:$0xff]  ;;  %v536_v29 = vld [vmem:[#allocation2 + $0x6e8] sm:$0xff] }
 0x13e   :  { %v194_v32 = vadd.f32 %v193_v31, %v122_v28  ;;  %v533_v28 = vld [vmem:[#allocation2 + $0x6d0] sm:$0xff] }
 0x13f   :  { %v196_v33 = vmul.f32 0.1, %v192_v30  ;;  %v1831_v31 = vpack.c.bf16 %v533_v28, %v531_v27  ;;  %v568_v28 = vld [vmem:[#allocation2 + $0x7e8] sm:$0xff] }
 0x140   :  { %v197_v34 = vmul.f32 0.1, %v194_v32 }
 0x141   :  { %v198_v36 = vmax.f32 %v192_v30, %v196_v33  ;;  %v538_v30 = vld [vmem:[#allocation2 + $0x6f8] sm:$0xff]  ;;  %v535_v33 = vld [vmem:[#allocation2 + $0x6e0] sm:$0xff] }
 0x142   :  { %v199_v35 = vmax.f32 %v194_v32, %v197_v34  ;;  %v1833_v32 = vpack.c.bf16 %v538_v30, %v536_v29  ;;  %v537_v34 = vld [vmem:[#allocation2 + $0x6f0] sm:$0xff]  ;;  %v570_v29 = vld [vmem:[#allocation2 + $0x7f8] sm:$0xff] }
 0x143   :  { %v1835_v37 = vpack.c.bf16 %v537_v34, %v535_v33  ;;  %v1865_v30 = vpack.c.bf16 %v570_v29, %v568_v28  ;;  %v661_v34 = vld [vmem:[#allocation2 + $0x808] sm:$0xff] }
 0x144   :  { %342 = vmatprep.mubr.f32.mxu1 %v199_v35  ;;  %v540_v35 = vld [vmem:[#allocation2 + $0x708] sm:$0xff] }
 0x145   :  { %343 = vmatmul.mubr.f32.vlgmr.msra.gmra.mrb[0].mxu1 %v198_v36  ;;  %v542_v36 = vld [vmem:[#allocation2 + $0x718] sm:$0xff] }
 0x146   :  { %1808 = vmatpush1.bf16.msra.mxu1 %v1807_v56  ;;  %v1837_v38 = vpack.c.bf16 %v542_v36, %v540_v35  ;;  %v1849_v56 = vpack.c.bf16 %v554_v54, %v552_v53  ;;  %v663_v35 = vld [vmem:[#allocation2 + $0x818] sm:$0xff]  ;;  %v660_v36 = vld [vmem:[#allocation2 + $0x800] sm:$0xff]  ;;  %v1881_v54 = vpack.c.bf16 %v675_v52, %v673_v51 }
 0x147   :  { %1810 = vmatprep.subr.bf16.mxu1 %v1809_v57  ;;  %v551_v57 = vld [vmem:[#allocation2 + $0x760] sm:$0xff]  ;;  %v715_v51 = vld [vmem:[#allocation2 + $0x9b8] sm:$0xff] }
 0x148   :  { %v1851_v61 = vpack.c.bf16 %v553_v58, %v551_v57  ;;  %v677_v57 = vld [vmem:[#allocation2 + $0x888] sm:$0xff]  ;;  %v679_v58 = vld [vmem:[#allocation2 + $0x898] sm:$0xff] }
 0x14a   :  { %1812 = vmatpush1.bf16.msra.mxu1 %v1811_v62  ;;  %v1853_v62 = vpack.c.bf16 %v558_v60, %v556_v59  ;;  %v1885_v60 = vpack.c.bf16 %v679_v58, %v677_v57  ;;  %v419_v57 = vld [vmem:[#allocation4 + $0x4] sm:$0x3] }
 0x14b   :  { %1814 = vmatprep.subr.bf16.mxu1 %v1813_v63  ;;  %v555_v63 = vld [vmem:[#allocation2 + $0x780] sm:$0xff]  ;;  %v424_v58 = vrot.slane %v419_v57, %v2378_v24 }
 0x14c   :  { %v1855_v3 = vpack.c.bf16 %v557_v0, %v555_v63  ;;  %v681_v63 = vld [vmem:[#allocation2 + $0x8a8] sm:$0xff]  ;;  %v683_v0 = vld [vmem:[#allocation2 + $0x8b8] sm:$0xff] }
 0x14e   :  { %1816 = vmatpush1.bf16.msra.mxu1 %v1815_v4  ;;  %v1857_v4 = vpack.c.bf16 %v562_v2, %v560_v1  ;;  %v1889_v2 = vpack.c.bf16 %v683_v0, %v681_v63 }
 0x14f   :  { %1818 = vmatprep.subr.bf16.mxu1 %v1817_v5  ;;  %v559_v5 = vld [vmem:[#allocation2 + $0x7a0] sm:$0xff] }
 0x150   :  { %v1859_v7 = vpack.c.bf16 %v561_v6, %v559_v5  ;;  %v685_v5 = vld [vmem:[#allocation2 + $0x8c8] sm:$0xff]  ;;  %v687_v6 = vld [vmem:[#allocation2 + $0x8d8] sm:$0xff] }
 0x152   :  { %1820 = vmatpush1.bf16.msra.mxu1 %v1819_v10  ;;  %v275_v10 = vrot.slane %v266_v8, %v2380_v26  ;;  %v1893_v8 = vpack.c.bf16 %v687_v6, %v685_v5  ;;  %v719_v5 = vld [vmem:[#allocation2 + $0x9d8] sm:$0xff] }
 0x153   :  { %1822 = vmatprep.subr.bf16.mxu1 %v1821_v11 }
 0x156   :  { %1824 = vmatpush1.bf16.msra.mxu1 %v1823_v16 }
 0x157   :  { %1826 = vmatprep.subr.bf16.mxu1 %v1825_v17 }
 0x15a   :  { %1828 = vmatpush1.bf16.msra.mxu1 %v1827_v23  ;;  %v563_v23 = vld [vmem:[#allocation2 + $0x7c0] sm:$0xff] }
 0x15b   :  { %1830 = vmatprep.subr.bf16.mxu1 %v1829_v25  ;;  %v565_v25 = vld [vmem:[#allocation2 + $0x7d0] sm:$0xff] }
 0x15c   :  { %v1863_v27 = vpack.c.bf16 %v565_v25, %v563_v23  ;;  %v694_v23 = vld [vmem:[#allocation2 + $0x910] sm:$0xff]  ;;  %v697_v25 = vld [vmem:[#allocation2 + $0x928] sm:$0xff] }
 0x15e   :  { %1832 = vmatpush1.bf16.msra.mxu1 %v1831_v31  ;;  %v567_v31 = vld [vmem:[#allocation2 + $0x7e0] sm:$0xff] }
 0x15f   :  { %1834 = vmatprep.subr.bf16.mxu1 %v1833_v32  ;;  %v569_v32 = vld [vmem:[#allocation2 + $0x7f0] sm:$0xff] }
 0x160   :  { %v1867_v33 = vpack.c.bf16 %v569_v32, %v567_v31  ;;  %v698_v31 = vld [vmem:[#allocation2 + $0x930] sm:$0xff]  ;;  %v701_v32 = vld [vmem:[#allocation2 + $0x948] sm:$0xff] }
 0x162   :  { %1836 = vmatpush1.bf16.msra.mxu1 %v1835_v37  ;;  %v1869_v37 = vpack.c.bf16 %v663_v35, %v661_v34 }
 0x163   :  { %1838 = vmatprep.subr.bf16.mxu1 %v1837_v38  ;;  %v662_v38 = vld [vmem:[#allocation2 + $0x810] sm:$0xff] }
 0x164   :  { %v1871_v41 = vpack.c.bf16 %v662_v38, %v660_v36  ;;  %1870 = vmatprep.subr.bf16.mxu0 %v1869_v37  ;;  %v700_v36 = vld [vmem:[#allocation2 + $0x940] sm:$0xff]  ;;  %v702_v37 = vld [vmem:[#allocation2 + $0x950] sm:$0xff]  ;;  %v705_v38 = vld [vmem:[#allocation2 + $0x968] sm:$0xff] }
 0x165   :  { %v1911_v40 = vpack.c.bf16 %v702_v37, %v700_v36  ;;  %v834_v36 = vld [vmem:[#allocation2 + $0xa68] sm:$0xff]  ;;  %v836_v37 = vld [vmem:[#allocation2 + $0xa78] sm:$0xff] }
 0x166   :  { %1840 = vmatpush1.bf16.msra.mxu1 %v1839_v43  ;;  %v664_v43 = vld [vmem:[#allocation2 + $0x820] sm:$0xff] }
 0x167   :  { %1842 = vmatprep.subr.bf16.mxu1 %v1841_v44  ;;  %v666_v44 = vld [vmem:[#allocation2 + $0x830] sm:$0xff] }
 0x168   :  { %v1875_v47 = vpack.c.bf16 %v666_v44, %v664_v43  ;;  %v706_v43 = vld [vmem:[#allocation2 + $0x970] sm:$0xff]  ;;  %v709_v44 = vld [vmem:[#allocation2 + $0x988] sm:$0xff] }
 0x16a   :  { %1844 = vmatpush1.bf16.msra.mxu1 %v1843_v49  ;;  %v668_v49 = vld [vmem:[#allocation2 + $0x840] sm:$0xff] }
 0x16b   :  { %1846 = vmatprep.subr.bf16.mxu1 %v1845_v50  ;;  %v670_v50 = vld [vmem:[#allocation2 + $0x850] sm:$0xff] }
 0x16c   :  { %v1879_v53 = vpack.c.bf16 %v670_v50, %v668_v49  ;;  %v710_v49 = vld [vmem:[#allocation2 + $0x990] sm:$0xff]  ;;  %v713_v50 = vld [vmem:[#allocation2 + $0x9a8] sm:$0xff] }
 0x16e   :  { %1848 = vmatpush1.bf16.msra.mxu1 %v1847_v55  ;;  %v672_v55 = vld [vmem:[#allocation2 + $0x860] sm:$0xff] }
 0x16f   :  { %1850 = vmatprep.subr.bf16.mxu1 %v1849_v56  ;;  %v674_v56 = vld [vmem:[#allocation2 + $0x870] sm:$0xff] }
 0x170   :  { %v1883_v59 = vpack.c.bf16 %v674_v56, %v672_v55  ;;  %v714_v55 = vld [vmem:[#allocation2 + $0x9b0] sm:$0xff] }
 0x172   :  { %1852 = vmatpush1.bf16.msra.mxu1 %v1851_v61  ;;  %v676_v61 = vld [vmem:[#allocation2 + $0x880] sm:$0xff] }
 0x173   :  { %1854 = vmatprep.subr.bf16.mxu1 %v1853_v62  ;;  %v678_v62 = vld [vmem:[#allocation2 + $0x890] sm:$0xff] }
 0x174   :  { %v1887_v1 = vpack.c.bf16 %v678_v62, %v676_v61 }
 0x176   :  { %1856 = vmatpush1.bf16.msra.mxu1 %v1855_v3  ;;  %v680_v3 = vld [vmem:[#allocation2 + $0x8a0] sm:$0xff] }
 0x177   :  { %1858 = vmatprep.subr.bf16.mxu1 %v1857_v4  ;;  %v682_v4 = vld [vmem:[#allocation2 + $0x8b0] sm:$0xff] }
 0x17a   :  { %1860 = vmatpush1.bf16.msra.mxu1 %v1859_v7  ;;  %v1891_v7 = vpack.c.bf16 %v682_v4, %v680_v3  ;;  %v717_v4 = vld [vmem:[#allocation2 + $0x9c8] sm:$0xff] }
 0x17b   :  { %1862 = vmatprep.subr.bf16.mxu1 %v1861_v21  ;;  %v692_v21 = vld [vmem:[#allocation2 + $0x900] sm:$0xff]  ;;  %v1925_v6 = vpack.c.bf16 %v719_v5, %v717_v4 }
 0x17c   :  { %v1903_v28 = vpack.c.bf16 %v694_v23, %v692_v21  ;;  %v826_v21 = vld [vmem:[#allocation2 + $0xa28] sm:$0xff]  ;;  %v828_v23 = vld [vmem:[#allocation2 + $0xa38] sm:$0xff] }
 0x17e   :  { %1864 = vmatpush1.bf16.msra.mxu1 %v1863_v27  ;;  %v699_v27 = vld [vmem:[#allocation2 + $0x938] sm:$0xff] }
 0x17f   :  { %1866 = vmatprep.subr.bf16.mxu1 %v1865_v30  ;;  %v1905_v29 = vpack.c.bf16 %v699_v27, %v697_v25  ;;  %v696_v30 = vld [vmem:[#allocation2 + $0x920] sm:$0xff]  ;;  %v1937_v27 = vpack.c.bf16 %v828_v23, %v826_v21 }
 0x180   :  { %v1907_v34 = vpack.c.bf16 %v698_v31, %v696_v30  ;;  %v830_v30 = vld [vmem:[#allocation2 + $0xa48] sm:$0xff]  ;;  %v832_v31 = vld [vmem:[#allocation2 + $0xa58] sm:$0xff] }
 0x182   :  { %1868 = vmatpush1.bf16.msra.mxu1 %v1867_v33  ;;  %v703_v33 = vld [vmem:[#allocation2 + $0x958] sm:$0xff] }
 0x183   :  { %v1909_v35 = vpack.c.bf16 %v703_v33, %v701_v32  ;;  %v1941_v33 = vpack.c.bf16 %v832_v31, %v830_v30 }
 0x218   :  { %v344_v11 = vpop.f32.mrb[0].mxu1 }
 0x219   :  { %v345_v12 = vadd.f32 %v344_v11, %v271_v9  ;;  %v346_v13 = vpop.f32.mrb[1].mxu1  ;;  %v684_v9 = vld [vmem:[#allocation2 + $0x8c0] sm:$0xff]  ;;  %v689_v11 = vld [vmem:[#allocation2 + $0x8e8] sm:$0xff] }
 0x21a   :  { %v347_v14 = vadd.f32 %v346_v13, %v275_v10  ;;  %v686_v10 = vld [vmem:[#allocation2 + $0x8d0] sm:$0xff] }
 0x21b   :  { %v349_v15 = vmul.f32 0.1, %v345_v12  ;;  %v1895_v13 = vpack.c.bf16 %v686_v10, %v684_v9  ;;  %v721_v10 = vld [vmem:[#allocation2 + $0x9e8] sm:$0xff] }
 0x21c   :  { %v350_v16 = vmul.f32 0.1, %v347_v14 }
 0x21d   :  { %v351_v18 = vmax.f32 %v345_v12, %v349_v15  ;;  %v691_v12 = vld [vmem:[#allocation2 + $0x8f8] sm:$0xff]  ;;  %v688_v15 = vld [vmem:[#allocation2 + $0x8e0] sm:$0xff] }
 0x21e   :  { %v352_v17 = vmax.f32 %v347_v14, %v350_v16  ;;  %v1897_v14 = vpack.c.bf16 %v691_v12, %v689_v11  ;;  %v690_v16 = vld [vmem:[#allocation2 + $0x8f0] sm:$0xff]  ;;  %v723_v11 = vld [vmem:[#allocation2 + $0x9f8] sm:$0xff] }
 0x21f   :  { %v1899_v19 = vpack.c.bf16 %v690_v16, %v688_v15  ;;  %v1929_v12 = vpack.c.bf16 %v723_v11, %v721_v10  ;;  %v822_v16 = vld [vmem:[#allocation2 + $0xa08] sm:$0xff] }
 0x220   :  { %495 = vmatprep.mubr.f32.mxu0 %v352_v17  ;;  %v693_v17 = vld [vmem:[#allocation2 + $0x908] sm:$0xff] }
 0x221   :  { %496 = vmatmul.mubr.f32.vlgmr.msra.gmra.mrb[2].mxu0 %v351_v18  ;;  %v695_v18 = vld [vmem:[#allocation2 + $0x918] sm:$0xff] }
 0x222   :  { %1872 = vmatpush1.bf16.msra.mxu0 %v1871_v41  ;;  %v1901_v20 = vpack.c.bf16 %v695_v18, %v693_v17  ;;  %v1913_v41 = vpack.c.bf16 %v707_v39, %v705_v38  ;;  %v824_v17 = vld [vmem:[#allocation2 + $0xa18] sm:$0xff]  ;;  %v821_v18 = vld [vmem:[#allocation2 + $0xa00] sm:$0xff]  ;;  %v1945_v39 = vpack.c.bf16 %v836_v37, %v834_v36 }
 0x223   :  { %1874 = vmatprep.subr.bf16.mxu0 %v1873_v42  ;;  %v704_v42 = vld [vmem:[#allocation2 + $0x960] sm:$0xff]  ;;  %v868_v36 = vld [vmem:[#allocation2 + $0xb78] sm:$0xff] }
 0x224   :  { %v1915_v46 = vpack.c.bf16 %v706_v43, %v704_v42  ;;  %v838_v42 = vld [vmem:[#allocation2 + $0xa88] sm:$0xff]  ;;  %v840_v43 = vld [vmem:[#allocation2 + $0xa98] sm:$0xff] }
 0x226   :  { %1876 = vmatpush1.bf16.msra.mxu0 %v1875_v47  ;;  %v1917_v47 = vpack.c.bf16 %v711_v45, %v709_v44  ;;  %v1949_v45 = vpack.c.bf16 %v840_v43, %v838_v42  ;;  %v872_v42 = vld [vmem:[#allocation2 + $0xb98] sm:$0xff] }
 0x227   :  { %1878 = vmatprep.subr.bf16.mxu0 %v1877_v48  ;;  %v708_v48 = vld [vmem:[#allocation2 + $0x980] sm:$0xff] }
 0x228   :  { %v1919_v52 = vpack.c.bf16 %v710_v49, %v708_v48  ;;  %v842_v48 = vld [vmem:[#allocation2 + $0xaa8] sm:$0xff]  ;;  %v844_v49 = vld [vmem:[#allocation2 + $0xab8] sm:$0xff] }
 0x22a   :  { %1880 = vmatpush1.bf16.msra.mxu0 %v1879_v53  ;;  %v1921_v53 = vpack.c.bf16 %v715_v51, %v713_v50  ;;  %v1953_v51 = vpack.c.bf16 %v844_v49, %v842_v48  ;;  %v876_v48 = vld [vmem:[#allocation2 + $0xbb8] sm:$0xff]  ;;  %v873_v49 = vld [vmem:[#allocation2 + $0xba0] sm:$0xff] }
 0x22b   :  { %1882 = vmatprep.subr.bf16.mxu0 %v1881_v54  ;;  %v712_v54 = vld [vmem:[#allocation2 + $0x9a0] sm:$0xff] }
 0x22c   :  { %v1923_v56 = vpack.c.bf16 %v714_v55, %v712_v54  ;;  %v846_v54 = vld [vmem:[#allocation2 + $0xac8] sm:$0xff]  ;;  %v848_v55 = vld [vmem:[#allocation2 + $0xad8] sm:$0xff] }
 0x22e   :  { %1884 = vmatpush1.bf16.msra.mxu0 %v1883_v59  ;;  %v428_v59 = vrot.slane %v419_v57, %v2380_v26  ;;  %v1957_v57 = vpack.c.bf16 %v848_v55, %v846_v54 }
 0x22f   :  { %1886 = vmatprep.subr.bf16.mxu0 %v1885_v60 }
 0x232   :  { %1888 = vmatpush1.bf16.msra.mxu0 %v1887_v1 }
 0x233   :  { %1890 = vmatprep.subr.bf16.mxu0 %v1889_v2 }
 0x236   :  { %1892 = vmatpush1.bf16.msra.mxu0 %v1891_v7  ;;  %v716_v7 = vld [vmem:[#allocation2 + $0x9c0] sm:$0xff] }
 0x237   :  { %1894 = vmatprep.subr.bf16.mxu0 %v1893_v8  ;;  %v718_v8 = vld [vmem:[#allocation2 + $0x9d0] sm:$0xff] }
 0x238   :  { %v1927_v9 = vpack.c.bf16 %v718_v8, %v716_v7  ;;  %v855_v7 = vld [vmem:[#allocation2 + $0xb10] sm:$0xff]  ;;  %v858_v8 = vld [vmem:[#allocation2 + $0xb28] sm:$0xff] }
 0x23a   :  { %1896 = vmatpush1.bf16.msra.mxu0 %v1895_v13  ;;  %v720_v13 = vld [vmem:[#allocation2 + $0x9e0] sm:$0xff] }
 0x23b   :  { %1898 = vmatprep.subr.bf16.mxu0 %v1897_v14  ;;  %v722_v14 = vld [vmem:[#allocation2 + $0x9f0] sm:$0xff] }
 0x23c   :  { %v1931_v15 = vpack.c.bf16 %v722_v14, %v720_v13  ;;  %v859_v13 = vld [vmem:[#allocation2 + $0xb30] sm:$0xff]  ;;  %v862_v14 = vld [vmem:[#allocation2 + $0xb48] sm:$0xff] }
 0x23e   :  { %1900 = vmatpush1.bf16.msra.mxu0 %v1899_v19  ;;  %v1933_v19 = vpack.c.bf16 %v824_v17, %v822_v16 }
 0x23f   :  { %1902 = vmatprep.subr.bf16.mxu0 %v1901_v20  ;;  %v823_v20 = vld [vmem:[#allocation2 + $0xa10] sm:$0xff] }
 0x240   :  { %v1935_v25 = vpack.c.bf16 %v823_v20, %v821_v18  ;;  %1934 = vmatprep.subr.bf16.mxu1 %v1933_v19  ;;  %v572_v18 = vld [vmem:[#allocation4 + $0x6] sm:$0x3] }
 0x241   :  { %v577_v19 = vrot.slane %v572_v18, %v2378_v24  ;;  %v581_v20 = vrot.slane %v572_v18, %v2380_v26  ;;  %v987_v18 = vld [vmem:[#allocation2 + $0xc68] sm:$0xff] }
 0x242   :  { %1904 = vmatpush1.bf16.msra.mxu0 %v1903_v28  ;;  %v825_v28 = vld [vmem:[#allocation2 + $0xa20] sm:$0xff] }
 0x243   :  { %1906 = vmatprep.subr.bf16.mxu0 %v1905_v29  ;;  %v827_v29 = vld [vmem:[#allocation2 + $0xa30] sm:$0xff] }
 0x244   :  { %v1939_v32 = vpack.c.bf16 %v827_v29, %v825_v28 }
 0x246   :  { %1908 = vmatpush1.bf16.msra.mxu0 %v1907_v34  ;;  %v829_v34 = vld [vmem:[#allocation2 + $0xa40] sm:$0xff] }
 0x247   :  { %1910 = vmatprep.subr.bf16.mxu0 %v1909_v35  ;;  %v831_v35 = vld [vmem:[#allocation2 + $0xa50] sm:$0xff] }
 0x248   :  { %v1943_v38 = vpack.c.bf16 %v831_v35, %v829_v34  ;;  %v866_v35 = vld [vmem:[#allocation2 + $0xb68] sm:$0xff] }
 0x249   :  { %v1977_v37 = vpack.c.bf16 %v868_v36, %v866_v35 }
 0x24a   :  { %1912 = vmatpush1.bf16.msra.mxu0 %v1911_v40  ;;  %v833_v40 = vld [vmem:[#allocation2 + $0xa60] sm:$0xff] }
 0x24b   :  { %1914 = vmatprep.subr.bf16.mxu0 %v1913_v41  ;;  %v835_v41 = vld [vmem:[#allocation2 + $0xa70] sm:$0xff] }
 0x24c   :  { %v1947_v44 = vpack.c.bf16 %v835_v41, %v833_v40  ;;  %v870_v41 = vld [vmem:[#allocation2 + $0xb88] sm:$0xff] }
 0x24d   :  { %v1981_v43 = vpack.c.bf16 %v872_v42, %v870_v41 }
 0x24e   :  { %1916 = vmatpush1.bf16.msra.mxu0 %v1915_v46  ;;  %v837_v46 = vld [vmem:[#allocation2 + $0xa80] sm:$0xff] }
 0x24f   :  { %1918 = vmatprep.subr.bf16.mxu0 %v1917_v47  ;;  %v839_v47 = vld [vmem:[#allocation2 + $0xa90] sm:$0xff] }
 0x250   :  { %v1951_v50 = vpack.c.bf16 %v839_v47, %v837_v46  ;;  %v874_v47 = vld [vmem:[#allocation2 + $0xba8] sm:$0xff] }
 0x252   :  { %1920 = vmatpush1.bf16.msra.mxu0 %v1919_v52  ;;  %v841_v52 = vld [vmem:[#allocation2 + $0xaa0] sm:$0xff] }
 0x253   :  { %1922 = vmatprep.subr.bf16.mxu0 %v1921_v53  ;;  %v843_v53 = vld [vmem:[#allocation2 + $0xab0] sm:$0xff] }
 0x256   :  { %1924 = vmatpush1.bf16.msra.mxu0 %v1923_v56  ;;  %v1955_v56 = vpack.c.bf16 %v843_v53, %v841_v52  ;;  %v878_v52 = vld [vmem:[#allocation2 + $0xbc8] sm:$0xff]  ;;  %v880_v53 = vld [vmem:[#allocation2 + $0xbd8] sm:$0xff] }
 0x257   :  { %1926 = vmatprep.subr.bf16.mxu0 %v1925_v6  ;;  %v853_v6 = vld [vmem:[#allocation2 + $0xb00] sm:$0xff]  ;;  %v1989_v55 = vpack.c.bf16 %v880_v53, %v878_v52  ;;  %v1009_v52 = vld [vmem:[#allocation2 + $0xd18] sm:$0xff] }
 0x258   :  { %v1967_v10 = vpack.c.bf16 %v855_v7, %v853_v6  ;;  %v979_v6 = vld [vmem:[#allocation2 + $0xc28] sm:$0xff]  ;;  %v981_v7 = vld [vmem:[#allocation2 + $0xc38] sm:$0xff] }
 0x25a   :  { %1928 = vmatpush1.bf16.msra.mxu0 %v1927_v9  ;;  %v860_v9 = vld [vmem:[#allocation2 + $0xb38] sm:$0xff] }
 0x25b   :  { %1930 = vmatprep.subr.bf16.mxu0 %v1929_v12  ;;  %v1969_v11 = vpack.c.bf16 %v860_v9, %v858_v8  ;;  %v857_v12 = vld [vmem:[#allocation2 + $0xb20] sm:$0xff]  ;;  %v2001_v9 = vpack.c.bf16 %v981_v7, %v979_v6  ;;  %v1021_v6 = vld [vmem:[#allocation2 + $0xd78] sm:$0xff] }
 0x25c   :  { %v1971_v16 = vpack.c.bf16 %v859_v13, %v857_v12  ;;  %v983_v12 = vld [vmem:[#allocation2 + $0xc48] sm:$0xff]  ;;  %v985_v13 = vld [vmem:[#allocation2 + $0xc58] sm:$0xff] }
 0x25e   :  { %1932 = vmatpush1.bf16.msra.mxu0 %v1931_v15  ;;  %v864_v15 = vld [vmem:[#allocation2 + $0xb58] sm:$0xff] }
 0x25f   :  { %v1973_v17 = vpack.c.bf16 %v864_v15, %v862_v14  ;;  %v2005_v15 = vpack.c.bf16 %v985_v13, %v983_v12  ;;  %v1025_v12 = vld [vmem:[#allocation2 + $0xd98] sm:$0xff] }
 0x2f4   :  { %v497_v60 = vpop.f32.mrb[2].mxu0 }
 0x2f5   :  { %v498_v61 = vadd.f32 %v497_v60, %v424_v58  ;;  %v499_v62 = vpop.f32.mrb[3].mxu0  ;;  %v845_v58 = vld [vmem:[#allocation2 + $0xac0] sm:$0xff]  ;;  %v850_v60 = vld [vmem:[#allocation2 + $0xae8] sm:$0xff] }
 0x2f6   :  { %v500_v63 = vadd.f32 %v499_v62, %v428_v59  ;;  %v847_v59 = vld [vmem:[#allocation2 + $0xad0] sm:$0xff] }
 0x2f7   :  { %v502_v0 = vmul.f32 0.1, %v498_v61  ;;  %v1959_v62 = vpack.c.bf16 %v847_v59, %v845_v58  ;;  %v882_v58 = vld [vmem:[#allocation2 + $0xbe8] sm:$0xff]  ;;  %v884_v59 = vld [vmem:[#allocation2 + $0xbf8] sm:$0xff] }
 0x2f8   :  { %v503_v1 = vmul.f32 0.1, %v500_v63 }
 0x2f9   :  { %v504_v3 = vmax.f32 %v498_v61, %v502_v0  ;;  %v852_v61 = vld [vmem:[#allocation2 + $0xaf8] sm:$0xff]  ;;  %v849_v0 = vld [vmem:[#allocation2 + $0xae0] sm:$0xff] }
 0x2fa   :  { %v505_v2 = vmax.f32 %v500_v63, %v503_v1  ;;  %v1961_v63 = vpack.c.bf16 %v852_v61, %v850_v60  ;;  %v851_v1 = vld [vmem:[#allocation2 + $0xaf0] sm:$0xff]  ;;  %v1993_v61 = vpack.c.bf16 %v884_v59, %v882_v58  ;;  %v1013_v58 = vld [vmem:[#allocation2 + $0xd38] sm:$0xff] }
 0x2fb   :  { %v1963_v4 = vpack.c.bf16 %v851_v1, %v849_v0  ;;  %v975_v1 = vld [vmem:[#allocation2 + $0xc08] sm:$0xff] }
 0x2fc   :  { %648 = vmatprep.mubr.f32.mxu1 %v505_v2  ;;  %v854_v2 = vld [vmem:[#allocation2 + $0xb08] sm:$0xff] }
 0x2fd   :  { %649 = vmatmul.mubr.f32.vlgmr.msra.gmra.mrb[2].mxu1 %v504_v3  ;;  %v856_v3 = vld [vmem:[#allocation2 + $0xb18] sm:$0xff] }
 0x2fe   :  { %1936 = vmatpush1.bf16.msra.mxu1 %v1935_v25  ;;  %v1965_v5 = vpack.c.bf16 %v856_v3, %v854_v2  ;;  %v977_v2 = vld [vmem:[#allocation2 + $0xc18] sm:$0xff]  ;;  %v974_v3 = vld [vmem:[#allocation2 + $0xc00] sm:$0xff] }
 0x2ff   :  { %1938 = vmatprep.subr.bf16.mxu1 %v1937_v27 }
 0x302   :  { %1940 = vmatpush1.bf16.msra.mxu1 %v1939_v32  ;;  %v861_v32 = vld [vmem:[#allocation2 + $0xb40] sm:$0xff] }
 0x303   :  { %1942 = vmatprep.subr.bf16.mxu1 %v1941_v33  ;;  %v863_v33 = vld [vmem:[#allocation2 + $0xb50] sm:$0xff] }
 0x304   :  { %v1975_v34 = vpack.c.bf16 %v863_v33, %v861_v32  ;;  %v992_v32 = vld [vmem:[#allocation2 + $0xc90] sm:$0xff]  ;;  %v995_v33 = vld [vmem:[#allocation2 + $0xca8] sm:$0xff] }
 0x306   :  { %1944 = vmatpush1.bf16.msra.mxu1 %v1943_v38  ;;  %v865_v38 = vld [vmem:[#allocation2 + $0xb60] sm:$0xff] }
 0x307   :  { %1946 = vmatprep.subr.bf16.mxu1 %v1945_v39  ;;  %v867_v39 = vld [vmem:[#allocation2 + $0xb70] sm:$0xff] }
 0x308   :  { %v1979_v40 = vpack.c.bf16 %v867_v39, %v865_v38  ;;  %v996_v38 = vld [vmem:[#allocation2 + $0xcb0] sm:$0xff]  ;;  %v999_v39 = vld [vmem:[#allocation2 + $0xcc8] sm:$0xff] }
 0x30a   :  { %1948 = vmatpush1.bf16.msra.mxu1 %v1947_v44  ;;  %v869_v44 = vld [vmem:[#allocation2 + $0xb80] sm:$0xff] }
 0x30b   :  { %1950 = vmatprep.subr.bf16.mxu1 %v1949_v45  ;;  %v871_v45 = vld [vmem:[#allocation2 + $0xb90] sm:$0xff] }
 0x30c   :  { %v1983_v46 = vpack.c.bf16 %v871_v45, %v869_v44  ;;  %v1000_v44 = vld [vmem:[#allocation2 + $0xcd0] sm:$0xff]  ;;  %v1003_v45 = vld [vmem:[#allocation2 + $0xce8] sm:$0xff] }
 0x30e   :  { %1952 = vmatpush1.bf16.msra.mxu1 %v1951_v50  ;;  %v1985_v50 = vpack.c.bf16 %v876_v48, %v874_v47 }
 0x30f   :  { %1954 = vmatprep.subr.bf16.mxu1 %v1953_v51  ;;  %v875_v51 = vld [vmem:[#allocation2 + $0xbb0] sm:$0xff] }
 0x310   :  { %v1987_v54 = vpack.c.bf16 %v875_v51, %v873_v49  ;;  %v1002_v49 = vld [vmem:[#allocation2 + $0xce0] sm:$0xff]  ;;  %v1007_v51 = vld [vmem:[#allocation2 + $0xd08] sm:$0xff] }
 0x312   :  { %1956 = vmatpush1.bf16.msra.mxu1 %v1955_v56  ;;  %v877_v56 = vld [vmem:[#allocation2 + $0xbc0] sm:$0xff] }
 0x313   :  { %1958 = vmatprep.subr.bf16.mxu1 %v1957_v57  ;;  %v879_v57 = vld [vmem:[#allocation2 + $0xbd0] sm:$0xff] }
 0x314   :  { %v1991_v60 = vpack.c.bf16 %v879_v57, %v877_v56  ;;  %v1008_v56 = vld [vmem:[#allocation2 + $0xd10] sm:$0xff]  ;;  %v1011_v57 = vld [vmem:[#allocation2 + $0xd28] sm:$0xff] }
 0x316   :  { %1960 = vmatpush1.bf16.msra.mxu1 %v1959_v62  ;;  %v881_v62 = vld [vmem:[#allocation2 + $0xbe0] sm:$0xff] }
 0x317   :  { %1962 = vmatprep.subr.bf16.mxu1 %v1961_v63  ;;  %v883_v63 = vld [vmem:[#allocation2 + $0xbf0] sm:$0xff] }
 0x318   :  { %v1995_v0 = vpack.c.bf16 %v883_v63, %v881_v62  ;;  %v1012_v62 = vld [vmem:[#allocation2 + $0xd30] sm:$0xff]  ;;  %v1015_v63 = vld [vmem:[#allocation2 + $0xd48] sm:$0xff] }
 0x31a   :  { %1964 = vmatpush1.bf16.msra.mxu1 %v1963_v4  ;;  %v1997_v4 = vpack.c.bf16 %v977_v2, %v975_v1 }
 0x31b   :  { %1966 = vmatprep.subr.bf16.mxu1 %v1965_v5  ;;  %v976_v5 = vld [vmem:[#allocation2 + $0xc10] sm:$0xff] }
 0x31c   :  { %v1999_v8 = vpack.c.bf16 %v976_v5, %v974_v3  ;;  %1998 = vmatprep.subr.bf16.mxu0 %v1997_v4  ;;  %v1014_v3 = vld [vmem:[#allocation2 + $0xd40] sm:$0xff]  ;;  %v1016_v4 = vld [vmem:[#allocation2 + $0xd50] sm:$0xff]  ;;  %v1019_v5 = vld [vmem:[#allocation2 + $0xd68] sm:$0xff] }
 0x31d   :  { %v2039_v7 = vpack.c.bf16 %v1016_v4, %v1014_v3  ;;  %v1134_v3 = vld [vmem:[#allocation2 + $0xe38] sm:$0xff] }
 0x31e   :  { %1968 = vmatpush1.bf16.msra.mxu1 %v1967_v10  ;;  %v978_v10 = vld [vmem:[#allocation2 + $0xc20] sm:$0xff] }
 0x31f   :  { %1970 = vmatprep.subr.bf16.mxu1 %v1969_v11  ;;  %v980_v11 = vld [vmem:[#allocation2 + $0xc30] sm:$0xff] }
 0x320   :  { %v2003_v14 = vpack.c.bf16 %v980_v11, %v978_v10  ;;  %v1020_v10 = vld [vmem:[#allocation2 + $0xd70] sm:$0xff]  ;;  %v1023_v11 = vld [vmem:[#allocation2 + $0xd88] sm:$0xff] }
 0x322   :  { %1972 = vmatpush1.bf16.msra.mxu1 %v1971_v16  ;;  %v982_v16 = vld [vmem:[#allocation2 + $0xc40] sm:$0xff] }
 0x323   :  { %1974 = vmatprep.subr.bf16.mxu1 %v1973_v17  ;;  %v984_v17 = vld [vmem:[#allocation2 + $0xc50] sm:$0xff] }
 0x326   :  { %1976 = vmatpush1.bf16.msra.mxu1 %v1975_v34  ;;  %v997_v34 = vld [vmem:[#allocation2 + $0xcb8] sm:$0xff] }
 0x327   :  { %1978 = vmatprep.subr.bf16.mxu1 %v1977_v37  ;;  %v2017_v36 = vpack.c.bf16 %v997_v34, %v995_v33  ;;  %v994_v37 = vld [vmem:[#allocation2 + $0xca0] sm:$0xff] }
 0x328   :  { %v2019_v41 = vpack.c.bf16 %v996_v38, %v994_v37  ;;  %v2399_v38 = vand.u32 127, %v44_v22 }
 0x32a   :  { %1980 = vmatpush1.bf16.msra.mxu1 %v1979_v40  ;;  %v1001_v40 = vld [vmem:[#allocation2 + $0xcd8] sm:$0xff] }
 0x32b   :  { %1982 = vmatprep.subr.bf16.mxu1 %v1981_v43  ;;  %v2021_v42 = vpack.c.bf16 %v1001_v40, %v999_v39  ;;  %v998_v43 = vld [vmem:[#allocation2 + $0xcc0] sm:$0xff]  ;;  %v2402_v39 = vadd.s32 128, %v2399_v38 }
 0x32c   :  { %v2023_v47 = vpack.c.bf16 %v1000_v44, %v998_v43  ;;  %v2271_v44 = vld [vmem:[%s2440_s0] sm:$0xff] }
 0x32d   :  { %v48_v40 = vand.u32 31, %v2402_v39 }
 0x32e   :  { %1984 = vmatpush1.bf16.msra.mxu1 %v1983_v46  ;;  %v1005_v46 = vld [vmem:[#allocation2 + $0xcf8] sm:$0xff] }
 0x32f   :  { %1986 = vmatprep.subr.bf16.mxu1 %v1985_v50  ;;  %v2025_v48 = vpack.c.bf16 %v1005_v46, %v1003_v45  ;;  %v1004_v50 = vld [vmem:[#allocation2 + $0xcf0] sm:$0xff]  ;;  %vm817_vm0 = vcmp.lt.s32.totalorder %v48_v40, 19  ;;  %v2272_v45 = vld [vmem:[%s2440_s0 + $0x8] sm:$0xff]  ;;  %vm1602_vm3 = vcmp.lt.s32.totalorder %v48_v40, 16 }
 0x330   :  { %v2027_v53 = vpack.c.bf16 %v1004_v50, %v1002_v49  ;;  %v1031_v49 = vld [vmem:[#allocation2 + $0xdc8] sm:$0xff]  ;;  %v1033_v50 = vld [vmem:[#allocation2 + $0xdd8] sm:$0xff] }
 0x332   :  { %1988 = vmatpush1.bf16.msra.mxu1 %v1987_v54  ;;  %v2029_v54 = vpack.c.bf16 %v1009_v52, %v1007_v51  ;;  %v2053_v51 = vpack.c.bf16 %v1033_v50, %v1031_v49  ;;  %v1030_v52 = vld [vmem:[#allocation2 + $0xdc0] sm:$0xff] }
 0x333   :  { %1990 = vmatprep.subr.bf16.mxu1 %v1989_v55  ;;  %v1006_v55 = vld [vmem:[#allocation2 + $0xd00] sm:$0xff] }
 0x334   :  { %v2031_v59 = vpack.c.bf16 %v1008_v56, %v1006_v55  ;;  %v1035_v55 = vld [vmem:[#allocation2 + $0xde8] sm:$0xff]  ;;  %v1037_v56 = vld [vmem:[#allocation2 + $0xdf8] sm:$0xff]  ;;  %v1155_v50 = vld [vmem:[#allocation2 + $0xee0] sm:$0xff] }
 0x336   :  { %1992 = vmatpush1.bf16.msra.mxu1 %v1991_v60  ;;  %v2033_v60 = vpack.c.bf16 %v1013_v58, %v1011_v57  ;;  %v2057_v57 = vpack.c.bf16 %v1037_v56, %v1035_v55  ;;  %v1034_v58 = vld [vmem:[#allocation2 + $0xde0] sm:$0xff] }
 0x337   :  { %1994 = vmatprep.subr.bf16.mxu1 %v1993_v61  ;;  %v1010_v61 = vld [vmem:[#allocation2 + $0xd20] sm:$0xff] }
 0x338   :  { %v2035_v1 = vpack.c.bf16 %v1012_v62, %v1010_v61  ;;  %v1128_v61 = vld [vmem:[#allocation2 + $0xe08] sm:$0xff]  ;;  %v1130_v62 = vld [vmem:[#allocation2 + $0xe18] sm:$0xff]  ;;  %v1159_v56 = vld [vmem:[#allocation2 + $0xf00] sm:$0xff] }
 0x33a   :  { %1996 = vmatpush1.bf16.msra.mxu1 %v1995_v0  ;;  %v1017_v0 = vld [vmem:[#allocation2 + $0xd58] sm:$0xff] }
 0x33b   :  { %v2037_v2 = vpack.c.bf16 %v1017_v0, %v1015_v63  ;;  %v1127_v63 = vld [vmem:[#allocation2 + $0xe00] sm:$0xff]  ;;  %v2061_v0 = vpack.c.bf16 %v1130_v62, %v1128_v61 }
 0x33c   :  { %v1163_v62 = vld [vmem:[#allocation2 + $0xf20] sm:$0xff] }
 0x33d   :  { %2062 = vmatprep.subr.bf16.mxu1 %v2061_v0  ;;  %v1168_v0 = vld [vmem:[#allocation2 + $0xf48] sm:$0xff] }
 0x3d0   :  { %v650_v21 = vpop.f32.mrb[2].mxu1 }
 0x3d1   :  { %v651_v23 = vadd.f32 %v650_v21, %v577_v19  ;;  %v652_v25 = vpop.f32.mrb[3].mxu1  ;;  %v989_v19 = vld [vmem:[#allocation2 + $0xc78] sm:$0xff] }
 0x3d2   :  { %v653_v27 = vadd.f32 %v652_v25, %v581_v20  ;;  %v2007_v20 = vpack.c.bf16 %v984_v17, %v982_v16  ;;  %v2009_v21 = vpack.c.bf16 %v989_v19, %v987_v18  ;;  %v988_v25 = vld [vmem:[#allocation2 + $0xc70] sm:$0xff]  ;;  %v1027_v17 = vld [vmem:[#allocation2 + $0xda8] sm:$0xff]  ;;  %v1029_v18 = vld [vmem:[#allocation2 + $0xdb8] sm:$0xff] }
 0x3d3   :  { %v655_v28 = vmul.f32 0.1, %v651_v23  ;;  %v1024_v16 = vld [vmem:[#allocation2 + $0xd90] sm:$0xff] }
 0x3d4   :  { %v656_v29 = vmul.f32 0.1, %v653_v27 }
 0x3d5   :  { %v657_v31 = vmax.f32 %v651_v23, %v655_v28  ;;  %v986_v23 = vld [vmem:[#allocation2 + $0xc60] sm:$0xff]  ;;  %v993_v28 = vld [vmem:[#allocation2 + $0xc98] sm:$0xff] }
 0x3d6   :  { %v658_v30 = vmax.f32 %v653_v27, %v656_v29  ;;  %v991_v27 = vld [vmem:[#allocation2 + $0xc88] sm:$0xff]  ;;  %v2011_v29 = vpack.c.bf16 %v988_v25, %v986_v23  ;;  %v1028_v23 = vld [vmem:[#allocation2 + $0xdb0] sm:$0xff] }
 0x3d8   :  { %801 = vmatprep.mubr.f32.mxu0 %v658_v30  ;;  %v2013_v30 = vpack.c.bf16 %v993_v28, %v991_v27  ;;  %v725_v27 = vld [vmem:[#allocation4 + $0x8] sm:$0x3] }
 0x3d9   :  { %802 = vmatmul.mubr.f32.vlgmr.msra.gmra.mrb[4].mxu0 %v657_v31  ;;  %v990_v31 = vld [vmem:[#allocation2 + $0xc80] sm:$0xff]  ;;  %v730_v28 = vrot.slane %v725_v27, %v2378_v24 }
 0x3da   :  { %2000 = vmatpush1.bf16.msra.mxu0 %v1999_v8  ;;  %v2015_v35 = vpack.c.bf16 %v992_v32, %v990_v31  ;;  %v2041_v8 = vpack.c.bf16 %v1021_v6, %v1019_v5  ;;  %v1131_v6 = vld [vmem:[#allocation2 + $0xe20] sm:$0xff] }
 0x3db   :  { %2002 = vmatprep.subr.bf16.mxu0 %v2001_v9  ;;  %v1018_v9 = vld [vmem:[#allocation2 + $0xd60] sm:$0xff] }
 0x3dc   :  { %v2043_v13 = vpack.c.bf16 %v1020_v10, %v1018_v9  ;;  %v1138_v9 = vld [vmem:[#allocation2 + $0xe58] sm:$0xff] }
 0x3de   :  { %2004 = vmatpush1.bf16.msra.mxu0 %v2003_v14  ;;  %v2045_v14 = vpack.c.bf16 %v1025_v12, %v1023_v11  ;;  %v1135_v12 = vld [vmem:[#allocation2 + $0xe40] sm:$0xff] }
 0x3df   :  { %2006 = vmatprep.subr.bf16.mxu0 %v2005_v15  ;;  %v1022_v15 = vld [vmem:[#allocation2 + $0xd80] sm:$0xff] }
 0x3e0   :  { %v2047_v19 = vpack.c.bf16 %v1024_v16, %v1022_v15  ;;  %v1142_v15 = vld [vmem:[#allocation2 + $0xe78] sm:$0xff] }
 0x3e2   :  { %2008 = vmatpush1.bf16.msra.mxu0 %v2007_v20  ;;  %v2049_v20 = vpack.c.bf16 %v1029_v18, %v1027_v17  ;;  %v1139_v18 = vld [vmem:[#allocation2 + $0xe60] sm:$0xff] }
 0x3e3   :  { %2010 = vmatprep.subr.bf16.mxu0 %v2009_v21  ;;  %v1026_v21 = vld [vmem:[#allocation2 + $0xda0] sm:$0xff] }
 0x3e4   :  { %v2051_v25 = vpack.c.bf16 %v1028_v23, %v1026_v21  ;;  %v1146_v21 = vld [vmem:[#allocation2 + $0xe98] sm:$0xff] }
 0x3e6   :  { %2012 = vmatpush1.bf16.msra.mxu0 %v2011_v29  ;;  %v734_v29 = vrot.slane %v725_v27, %v2380_v26  ;;  %v1143_v27 = vld [vmem:[#allocation2 + $0xe80] sm:$0xff] }
 0x3e7   :  { %2014 = vmatprep.subr.bf16.mxu0 %v2013_v30 }
 0x3ea   :  { %2016 = vmatpush1.bf16.msra.mxu0 %v2015_v35 }
 0x3eb   :  { %2018 = vmatprep.subr.bf16.mxu0 %v2017_v36 }
 0x3ee   :  { %2020 = vmatpush1.bf16.msra.mxu0 %v2019_v41  ;;  %v47_v41 = vand.u32 31, %v2399_v38 }
 0x3ef   :  { %2022 = vmatprep.subr.bf16.mxu0 %v2021_v42 }
 0x3f0   :  { %vm816_vm1 = vcmp.lt.s32.totalorder %v47_v41, 19  ;;  %vm1601_vm2 = vcmp.lt.s32.totalorder %v47_v41, 16 }
 0x3f2   :  { %2024 = vmatpush1.bf16.msra.mxu0 %v2023_v47 }
 0x3f3   :  { %2026 = vmatprep.subr.bf16.mxu0 %v2025_v48 }
 0x3f6   :  { %2028 = vmatpush1.bf16.msra.mxu0 %v2027_v53  ;;  %v1032_v53 = vld [vmem:[#allocation2 + $0xdd0] sm:$0xff] }
 0x3f7   :  { %2030 = vmatprep.subr.bf16.mxu0 %v2029_v54  ;;  %v2055_v54 = vpack.c.bf16 %v1032_v53, %v1030_v52  ;;  %v1160_v52 = vld [vmem:[#allocation2 + $0xf08] sm:$0xff]  ;;  %v1162_v53 = vld [vmem:[#allocation2 + $0xf18] sm:$0xff] }
 0x3f8   :  { %v2093_v55 = vpack.c.bf16 %v1162_v53, %v1160_v52  ;;  %v1187_v53 = vld [vmem:[#allocation2 + $0xfe0] sm:$0xff] }
 0x3fa   :  { %2032 = vmatpush1.bf16.msra.mxu0 %v2031_v59  ;;  %v1036_v59 = vld [vmem:[#allocation2 + $0xdf0] sm:$0xff] }
 0x3fb   :  { %2034 = vmatprep.subr.bf16.mxu0 %v2033_v60  ;;  %v2059_v60 = vpack.c.bf16 %v1036_v59, %v1034_v58  ;;  %v1164_v58 = vld [vmem:[#allocation2 + $0xf28] sm:$0xff]  ;;  %v1166_v59 = vld [vmem:[#allocation2 + $0xf38] sm:$0xff] }
 0x3fc   :  { %v2097_v61 = vpack.c.bf16 %v1166_v59, %v1164_v58  ;;  %v1280_v58 = vld [vmem:[#allocation2 + $0x1000] sm:$0xff] }
 0x3fe   :  { %2036 = vmatpush1.bf16.msra.mxu0 %v2035_v1  ;;  %v1129_v1 = vld [vmem:[#allocation2 + $0xe10] sm:$0xff] }
 0x3ff   :  { %2038 = vmatprep.subr.bf16.mxu0 %v2037_v2  ;;  %v1132_v2 = vld [vmem:[#allocation2 + $0xe28] sm:$0xff]  ;;  %v2063_v4 = vpack.c.bf16 %v1129_v1, %v1127_v63  ;;  %v1165_v63 = vld [vmem:[#allocation2 + $0xf30] sm:$0xff]  ;;  %v1170_v1 = vld [vmem:[#allocation2 + $0xf58] sm:$0xff] }
 0x400   :  { %v2065_v5 = vpack.c.bf16 %v1134_v3, %v1132_v2  ;;  %v2099_v2 = vpack.c.bf16 %v1165_v63, %v1163_v62  ;;  %v2101_v3 = vpack.c.bf16 %v1170_v1, %v1168_v0  ;;  %v1287_v62 = vld [vmem:[#allocation2 + $0x1038] sm:$0xff]  ;;  %v1284_v1 = vld [vmem:[#allocation2 + $0x1020] sm:$0xff] }
 0x402   :  { %2040 = vmatpush1.bf16.msra.mxu0 %v2039_v7  ;;  %v1133_v7 = vld [vmem:[#allocation2 + $0xe30] sm:$0xff] }
 0x403   :  { %2042 = vmatprep.subr.bf16.mxu0 %v2041_v8  ;;  %v1136_v8 = vld [vmem:[#allocation2 + $0xe48] sm:$0xff]  ;;  %v2067_v10 = vpack.c.bf16 %v1133_v7, %v1131_v6  ;;  %v1174_v7 = vld [vmem:[#allocation2 + $0xf78] sm:$0xff] }
 0x404   :  { %v2069_v11 = vpack.c.bf16 %v1138_v9, %v1136_v8  ;;  %v1172_v6 = vld [vmem:[#allocation2 + $0xf68] sm:$0xff] }
 0x405   :  { %v2105_v9 = vpack.c.bf16 %v1174_v7, %v1172_v6  ;;  %v1288_v7 = vld [vmem:[#allocation2 + $0x1040] sm:$0xff] }
 0x406   :  { %2044 = vmatpush1.bf16.msra.mxu0 %v2043_v13  ;;  %v1137_v13 = vld [vmem:[#allocation2 + $0xe50] sm:$0xff] }
 0x407   :  { %2046 = vmatprep.subr.bf16.mxu0 %v2045_v14  ;;  %v1140_v14 = vld [vmem:[#allocation2 + $0xe68] sm:$0xff]  ;;  %v2071_v16 = vpack.c.bf16 %v1137_v13, %v1135_v12  ;;  %v1178_v13 = vld [vmem:[#allocation2 + $0xf98] sm:$0xff] }
 0x408   :  { %v2073_v17 = vpack.c.bf16 %v1142_v15, %v1140_v14  ;;  %v1176_v12 = vld [vmem:[#allocation2 + $0xf88] sm:$0xff] }
 0x409   :  { %v2109_v15 = vpack.c.bf16 %v1178_v13, %v1176_v12  ;;  %v1292_v13 = vld [vmem:[#allocation2 + $0x1060] sm:$0xff] }
 0x40a   :  { %2048 = vmatpush1.bf16.msra.mxu0 %v2047_v19  ;;  %v1141_v19 = vld [vmem:[#allocation2 + $0xe70] sm:$0xff] }
 0x40b   :  { %2050 = vmatprep.subr.bf16.mxu0 %v2049_v20  ;;  %v1144_v20 = vld [vmem:[#allocation2 + $0xe88] sm:$0xff]  ;;  %v2075_v23 = vpack.c.bf16 %v1141_v19, %v1139_v18  ;;  %v1182_v19 = vld [vmem:[#allocation2 + $0xfb8] sm:$0xff] }
 0x40c   :  { %v1180_v18 = vld [vmem:[#allocation2 + $0xfa8] sm:$0xff] }
 0x40e   :  { %2052 = vmatpush1.bf16.msra.mxu0 %v2051_v25  ;;  %v2077_v25 = vpack.c.bf16 %v1146_v21, %v1144_v20  ;;  %v2113_v21 = vpack.c.bf16 %v1182_v19, %v1180_v18  ;;  %v1296_v19 = vld [vmem:[#allocation2 + $0x1080] sm:$0xff] }
 0x40f   :  { %2054 = vmatprep.subr.bf16.mxu0 %v2053_v51  ;;  %v1157_v51 = vld [vmem:[#allocation2 + $0xef0] sm:$0xff] }
 0x412   :  { %2056 = vmatpush1.bf16.msra.mxu0 %v2055_v54  ;;  %v2091_v54 = vpack.c.bf16 %v1157_v51, %v1155_v50  ;;  %v1188_v50 = vld [vmem:[#allocation2 + $0xfe8] sm:$0xff]  ;;  %v1190_v51 = vld [vmem:[#allocation2 + $0xff8] sm:$0xff] }
 0x413   :  { %2058 = vmatprep.subr.bf16.mxu0 %v2057_v57  ;;  %v1161_v57 = vld [vmem:[#allocation2 + $0xf10] sm:$0xff]  ;;  %v2121_v52 = vpack.c.bf16 %v1190_v51, %v1188_v50  ;;  %v1312_v51 = vld [vmem:[#allocation2 + $0x1100] sm:$0xff] }
 0x416   :  { %2060 = vmatpush1.bf16.msra.mxu0 %v2059_v60  ;;  %v2095_v60 = vpack.c.bf16 %v1161_v57, %v1159_v56  ;;  %v1281_v56 = vld [vmem:[#allocation2 + $0x1008] sm:$0xff]  ;;  %v1283_v57 = vld [vmem:[#allocation2 + $0x1018] sm:$0xff] }
 0x417   :  { %v2125_v59 = vpack.c.bf16 %v1283_v57, %v1281_v56  ;;  %v1316_v57 = vld [vmem:[#allocation2 + $0x1120] sm:$0xff] }
 0x419   :  { %2126 = vmatprep.subr.bf16.mxu0 %v2125_v59  ;;  %v1321_v59 = vld [vmem:[#allocation2 + $0x1148] sm:$0xff] }
 0x4ac   :  { %v803_v30 = vpop.f32.mrb[4].mxu0 }
 0x4ad   :  { %v2392_v31 = vadd.f32 %v803_v30, %v730_v28  ;;  %v805_v32 = vpop.f32.mrb[5].mxu0  ;;  %v1145_v28 = vld [vmem:[#allocation2 + $0xe90] sm:$0xff]  ;;  %v1150_v30 = vld [vmem:[#allocation2 + $0xeb8] sm:$0xff] }
 0x4ae   :  { %v2394_v33 = vadd.f32 %v805_v32, %v734_v29  ;;  %v1148_v29 = vld [vmem:[#allocation2 + $0xea8] sm:$0xff]  ;;  %v2079_v32 = vpack.c.bf16 %v1145_v28, %v1143_v27 }
 0x4af   :  { %v808_v34 = vmul.f32 0.5, %v2392_v31  ;;  %v886_v28 = vld [vmem:[#allocation4 + $0xa] sm:$0x3] }
 0x4b0   :  { %v809_v35 = vmul.f32 0.5, %v2394_v33 }
 0x4b1   :  { %v810_v36 = vmul.f32 1.442695, %v808_v34  ;;  %v2081_v34 = vpack.c.bf16 %v1150_v30, %v1148_v29  ;;  %v891_v29 = vrot.slane %v886_v28, %v2378_v24  ;;  %v895_v30 = vrot.slane %v886_v28, %v2380_v26  ;;  %v1300_v28 = vld [vmem:[#allocation2 + $0x10a0] sm:$0xff] }
 0x4b2   :  { %v812_v37 = vmul.f32 1.442695, %v809_v35  ;;  %v1147_v35 = vld [vmem:[#allocation2 + $0xea0] sm:$0xff] }
 0x4b3   :  { %2259 = vpow2.f32 %v810_v36  ;;  %v1149_v36 = vld [vmem:[#allocation2 + $0xeb0] sm:$0xff] }
 0x4b4   :  { %2261 = vpow2.f32 %v812_v37  ;;  %v1152_v37 = vld [vmem:[#allocation2 + $0xec8] sm:$0xff] }
 0x4bd   :  { %v2260_v42 = vpop.eup %2259 }
 0x4be   :  { %v2262_v43 = vpop.eup %2261  ;;  %v814_v22 = vmul.f32 %v2271_v44, %v2260_v42  ;;  %v1154_v42 = vld [vmem:[#allocation2 + $0xed8] sm:$0xff] }
 0x4bf   :  { %v815_v46 = vmul.f32 %v2272_v45, %v2262_v43  ;;  %v2083_v43 = vpack.c.bf16 %v1149_v36, %v1147_v35  ;;  %v2085_v44 = vpack.c.bf16 %v1154_v42, %v1152_v37  ;;  %v1153_v45 = vld [vmem:[#allocation2 + $0xed0] sm:$0xff] }
 0x4c0   :  { %v818_v48 = vsel %vm816_vm1, %v2392_v31, %v814_v22  ;;  %v1151_v22 = vld [vmem:[#allocation2 + $0xec0] sm:$0xff] }
 0x4c1   :  { %v819_v47 = vsel %vm817_vm0, %v2394_v33, %v815_v46  ;;  %v1156_v46 = vld [vmem:[#allocation2 + $0xee8] sm:$0xff] }
 0x4c2   :  { %962 = vmatprep.mubr.f32.mxu1 %v819_v47  ;;  %v1158_v47 = vld [vmem:[#allocation2 + $0xef8] sm:$0xff] }
 0x4c3   :  { %963 = vmatmul.mubr.f32.vlgmr.msra.gmra.mrb[4].mxu1 %v818_v48  ;;  %v2087_v48 = vpack.c.bf16 %v1153_v45, %v1151_v22  ;;  %v2089_v49 = vpack.c.bf16 %v1158_v47, %v1156_v46  ;;  %v1184_v22 = vld [vmem:[#allocation2 + $0xfc8] sm:$0xff]  ;;  %v1186_v45 = vld [vmem:[#allocation2 + $0xfd8] sm:$0xff]  ;;  %v1183_v47 = vld [vmem:[#allocation2 + $0xfc0] sm:$0xff] }
 0x4c4   :  { %2064 = vmatpush1.bf16.msra.mxu1 %v2063_v4  ;;  %v1167_v4 = vld [vmem:[#allocation2 + $0xf40] sm:$0xff]  ;;  %v2117_v46 = vpack.c.bf16 %v1186_v45, %v1184_v22 }
 0x4c5   :  { %2066 = vmatprep.subr.bf16.mxu1 %v2065_v5  ;;  %v1169_v5 = vld [vmem:[#allocation2 + $0xf50] sm:$0xff]  ;;  %v1308_v45 = vld [vmem:[#allocation2 + $0x10e0] sm:$0xff] }
 0x4c6   :  { %v2103_v8 = vpack.c.bf16 %v1169_v5, %v1167_v4  ;;  %v1291_v4 = vld [vmem:[#allocation2 + $0x1058] sm:$0xff] }
 0x4c8   :  { %2068 = vmatpush1.bf16.msra.mxu1 %v2067_v10  ;;  %v1171_v10 = vld [vmem:[#allocation2 + $0xf60] sm:$0xff] }
 0x4c9   :  { %2070 = vmatprep.subr.bf16.mxu1 %v2069_v11  ;;  %v1173_v11 = vld [vmem:[#allocation2 + $0xf70] sm:$0xff] }
 0x4ca   :  { %v2107_v14 = vpack.c.bf16 %v1173_v11, %v1171_v10  ;;  %v1295_v10 = vld [vmem:[#allocation2 + $0x1078] sm:$0xff] }
 0x4cc   :  { %2072 = vmatpush1.bf16.msra.mxu1 %v2071_v16  ;;  %v1175_v16 = vld [vmem:[#allocation2 + $0xf80] sm:$0xff] }
 0x4cd   :  { %2074 = vmatprep.subr.bf16.mxu1 %v2073_v17  ;;  %v1177_v17 = vld [vmem:[#allocation2 + $0xf90] sm:$0xff] }
 0x4ce   :  { %v2111_v20 = vpack.c.bf16 %v1177_v17, %v1175_v16  ;;  %v1299_v16 = vld [vmem:[#allocation2 + $0x1098] sm:$0xff] }
 0x4d0   :  { %2076 = vmatpush1.bf16.msra.mxu1 %v2075_v23  ;;  %v1179_v23 = vld [vmem:[#allocation2 + $0xfa0] sm:$0xff] }
 0x4d1   :  { %2078 = vmatprep.subr.bf16.mxu1 %v2077_v25  ;;  %v1181_v25 = vld [vmem:[#allocation2 + $0xfb0] sm:$0xff] }
 0x4d2   :  { %v2115_v27 = vpack.c.bf16 %v1181_v25, %v1179_v23  ;;  %v1303_v23 = vld [vmem:[#allocation2 + $0x10b8] sm:$0xff] }
 0x4d4   :  { %2080 = vmatpush1.bf16.msra.mxu1 %v2079_v32 }
 0x4d5   :  { %2082 = vmatprep.subr.bf16.mxu1 %v2081_v34 }
 0x4d8   :  { %2084 = vmatpush1.bf16.msra.mxu1 %v2083_v43 }
 0x4d9   :  { %2086 = vmatprep.subr.bf16.mxu1 %v2085_v44 }
 0x4dc   :  { %2088 = vmatpush1.bf16.msra.mxu1 %v2087_v48  ;;  %v1185_v48 = vld [vmem:[#allocation2 + $0xfd0] sm:$0xff] }
 0x4dd   :  { %2090 = vmatprep.subr.bf16.mxu1 %v2089_v49  ;;  %v2119_v49 = vpack.c.bf16 %v1185_v48, %v1183_v47  ;;  %v1313_v47 = vld [vmem:[#allocation2 + $0x1108] sm:$0xff]  ;;  %v1315_v48 = vld [vmem:[#allocation2 + $0x1118] sm:$0xff] }
 0x4de   :  { %v2157_v50 = vpack.c.bf16 %v1315_v48, %v1313_v47  ;;  %v1340_v48 = vld [vmem:[#allocation2 + $0x11e0] sm:$0xff] }
 0x4e0   :  { %2092 = vmatpush1.bf16.msra.mxu1 %v2091_v54  ;;  %v1189_v54 = vld [vmem:[#allocation2 + $0xff0] sm:$0xff] }
 0x4e1   :  { %2094 = vmatprep.subr.bf16.mxu1 %v2093_v55  ;;  %v2123_v55 = vpack.c.bf16 %v1189_v54, %v1187_v53  ;;  %v1317_v53 = vld [vmem:[#allocation2 + $0x1128] sm:$0xff]  ;;  %v1319_v54 = vld [vmem:[#allocation2 + $0x1138] sm:$0xff] }
 0x4e2   :  { %v2161_v56 = vpack.c.bf16 %v1319_v54, %v1317_v53  ;;  %v1433_v53 = vld [vmem:[#allocation2 + $0x1200] sm:$0xff] }
 0x4e4   :  { %2096 = vmatpush1.bf16.msra.mxu1 %v2095_v60  ;;  %v1282_v60 = vld [vmem:[#allocation2 + $0x1010] sm:$0xff] }
 0x4e5   :  { %2098 = vmatprep.subr.bf16.mxu1 %v2097_v61  ;;  %v1285_v61 = vld [vmem:[#allocation2 + $0x1028] sm:$0xff]  ;;  %v2127_v63 = vpack.c.bf16 %v1282_v60, %v1280_v58  ;;  %v1318_v58 = vld [vmem:[#allocation2 + $0x1130] sm:$0xff]  ;;  %v1323_v60 = vld [vmem:[#allocation2 + $0x1158] sm:$0xff] }
 0x4e6   :  { %v2129_v0 = vpack.c.bf16 %v1287_v62, %v1285_v61  ;;  %v2163_v61 = vpack.c.bf16 %v1318_v58, %v1316_v57  ;;  %v2165_v62 = vpack.c.bf16 %v1323_v60, %v1321_v59  ;;  %v1440_v57 = vld [vmem:[#allocation2 + $0x1238] sm:$0xff]  ;;  %v1437_v60 = vld [vmem:[#allocation2 + $0x1220] sm:$0xff] }
 0x4e8   :  { %2100 = vmatpush1.bf16.msra.mxu1 %v2099_v2  ;;  %v1286_v2 = vld [vmem:[#allocation2 + $0x1030] sm:$0xff] }
 0x4e9   :  { %2102 = vmatprep.subr.bf16.mxu1 %v2101_v3  ;;  %v1289_v3 = vld [vmem:[#allocation2 + $0x1048] sm:$0xff]  ;;  %v2131_v5 = vpack.c.bf16 %v1286_v2, %v1284_v1  ;;  %v1327_v2 = vld [vmem:[#allocation2 + $0x1178] sm:$0xff] }
 0x4ea   :  { %v2133_v6 = vpack.c.bf16 %v1291_v4, %v1289_v3  ;;  %v1325_v1 = vld [vmem:[#allocation2 + $0x1168] sm:$0xff] }
 0x4eb   :  { %v2169_v4 = vpack.c.bf16 %v1327_v2, %v1325_v1  ;;  %v1441_v2 = vld [vmem:[#allocation2 + $0x1240] sm:$0xff] }
 0x4ec   :  { %2104 = vmatpush1.bf16.msra.mxu1 %v2103_v8  ;;  %v1290_v8 = vld [vmem:[#allocation2 + $0x1050] sm:$0xff] }
 0x4ed   :  { %2106 = vmatprep.subr.bf16.mxu1 %v2105_v9  ;;  %v1293_v9 = vld [vmem:[#allocation2 + $0x1068] sm:$0xff]  ;;  %v2135_v11 = vpack.c.bf16 %v1290_v8, %v1288_v7  ;;  %v1331_v8 = vld [vmem:[#allocation2 + $0x1198] sm:$0xff] }
 0x4ee   :  { %v2137_v12 = vpack.c.bf16 %v1295_v10, %v1293_v9  ;;  %v1329_v7 = vld [vmem:[#allocation2 + $0x1188] sm:$0xff] }
 0x4ef   :  { %v2173_v10 = vpack.c.bf16 %v1331_v8, %v1329_v7  ;;  %v1445_v8 = vld [vmem:[#allocation2 + $0x1260] sm:$0xff] }
 0x4f0   :  { %2108 = vmatpush1.bf16.msra.mxu1 %v2107_v14  ;;  %v1294_v14 = vld [vmem:[#allocation2 + $0x1070] sm:$0xff] }
 0x4f1   :  { %2110 = vmatprep.subr.bf16.mxu1 %v2109_v15  ;;  %v1297_v15 = vld [vmem:[#allocation2 + $0x1088] sm:$0xff]  ;;  %v2139_v17 = vpack.c.bf16 %v1294_v14, %v1292_v13  ;;  %v1335_v14 = vld [vmem:[#allocation2 + $0x11b8] sm:$0xff] }
 0x4f2   :  { %v2141_v18 = vpack.c.bf16 %v1299_v16, %v1297_v15  ;;  %v1333_v13 = vld [vmem:[#allocation2 + $0x11a8] sm:$0xff] }
 0x4f3   :  { %v2177_v16 = vpack.c.bf16 %v1335_v14, %v1333_v13  ;;  %v1449_v14 = vld [vmem:[#allocation2 + $0x1280] sm:$0xff] }
 0x4f4   :  { %2112 = vmatpush1.bf16.msra.mxu1 %v2111_v20  ;;  %v1298_v20 = vld [vmem:[#allocation2 + $0x1090] sm:$0xff] }
 0x4f5   :  { %2114 = vmatprep.subr.bf16.mxu1 %v2113_v21  ;;  %v1301_v21 = vld [vmem:[#allocation2 + $0x10a8] sm:$0xff]  ;;  %v2143_v25 = vpack.c.bf16 %v1298_v20, %v1296_v19 }
 0x4f6   :  { %v1039_v20 = vld [vmem:[#allocation4 + $0xc] sm:$0x3] }
 0x4f8   :  { %2116 = vmatpush1.bf16.msra.mxu1 %v2115_v27  ;;  %v2145_v27 = vpack.c.bf16 %v1303_v23, %v1301_v21  ;;  %v1044_v21 = vrot.slane %v1039_v20, %v2378_v24  ;;  %v1048_v23 = vrot.slane %v1039_v20, %v2380_v26  ;;  %v1453_v20 = vld [vmem:[#allocation2 + $0x12a0] sm:$0xff] }
 0x4f9   :  { %2118 = vmatprep.subr.bf16.mxu1 %v2117_v46  ;;  %v1310_v46 = vld [vmem:[#allocation2 + $0x10f0] sm:$0xff] }
 0x4fc   :  { %2120 = vmatpush1.bf16.msra.mxu1 %v2119_v49  ;;  %v2155_v49 = vpack.c.bf16 %v1310_v46, %v1308_v45  ;;  %v1341_v45 = vld [vmem:[#allocation2 + $0x11e8] sm:$0xff]  ;;  %v1343_v46 = vld [vmem:[#allocation2 + $0x11f8] sm:$0xff] }
 0x4fd   :  { %2122 = vmatprep.subr.bf16.mxu1 %v2121_v52  ;;  %v1314_v52 = vld [vmem:[#allocation2 + $0x1110] sm:$0xff]  ;;  %v2185_v47 = vpack.c.bf16 %v1343_v46, %v1341_v45  ;;  %v1465_v46 = vld [vmem:[#allocation2 + $0x1300] sm:$0xff] }
 0x500   :  { %2124 = vmatpush1.bf16.msra.mxu1 %v2123_v55  ;;  %v2159_v55 = vpack.c.bf16 %v1314_v52, %v1312_v51  ;;  %v1434_v51 = vld [vmem:[#allocation2 + $0x1208] sm:$0xff]  ;;  %v1436_v52 = vld [vmem:[#allocation2 + $0x1218] sm:$0xff] }
 0x501   :  { %v2189_v54 = vpack.c.bf16 %v1436_v52, %v1434_v51  ;;  %v1469_v52 = vld [vmem:[#allocation2 + $0x1320] sm:$0xff] }
 0x503   :  { %2190 = vmatprep.subr.bf16.mxu1 %v2189_v54  ;;  %v1474_v54 = vld [vmem:[#allocation2 + $0x1348] sm:$0xff] }
 0x596   :  { %v964_v32 = vpop.f32.mrb[4].mxu1 }
 0x597   :  { %v965_v34 = vadd.f32 %v964_v32, %v891_v29  ;;  %v966_v35 = vpop.f32.mrb[5].mxu1  ;;  %v1302_v29 = vld [vmem:[#allocation2 + $0x10b0] sm:$0xff]  ;;  %v1307_v32 = vld [vmem:[#allocation2 + $0x10d8] sm:$0xff] }
 0x598   :  { %v967_v36 = vadd.f32 %v966_v35, %v895_v30  ;;  %v1305_v30 = vld [vmem:[#allocation2 + $0x10c8] sm:$0xff] }
 0x599   :  { %v969_v37 = vmul.f32 0.1, %v965_v34  ;;  %v2149_v35 = vpack.c.bf16 %v1307_v32, %v1305_v30 }
 0x59a   :  { %v970_v42 = vmul.f32 0.1, %v967_v36 }
 0x59b   :  { %v971_v44 = vmax.f32 %v965_v34, %v969_v37  ;;  %v2147_v34 = vpack.c.bf16 %v1302_v29, %v1300_v28  ;;  %v1306_v37 = vld [vmem:[#allocation2 + $0x10d0] sm:$0xff] }
 0x59c   :  { %v972_v43 = vmax.f32 %v967_v36, %v970_v42  ;;  %v1304_v36 = vld [vmem:[#allocation2 + $0x10c0] sm:$0xff]  ;;  %v1309_v42 = vld [vmem:[#allocation2 + $0x10e8] sm:$0xff] }
 0x59e   :  { %1115 = vmatprep.mubr.f32.mxu0 %v972_v43  ;;  %v1311_v43 = vld [vmem:[#allocation2 + $0x10f8] sm:$0xff] }
 0x59f   :  { %1116 = vmatmul.mubr.f32.vlgmr.msra.gmra.mrb[6].mxu0 %v971_v44  ;;  %v2151_v44 = vpack.c.bf16 %v1306_v37, %v1304_v36  ;;  %v2153_v22 = vpack.c.bf16 %v1311_v43, %v1309_v42  ;;  %v1337_v36 = vld [vmem:[#allocation2 + $0x11c8] sm:$0xff]  ;;  %v1339_v37 = vld [vmem:[#allocation2 + $0x11d8] sm:$0xff]  ;;  %v1336_v43 = vld [vmem:[#allocation2 + $0x11c0] sm:$0xff] }
 0x5a0   :  { %2128 = vmatpush1.bf16.msra.mxu0 %v2127_v63  ;;  %v1320_v63 = vld [vmem:[#allocation2 + $0x1140] sm:$0xff]  ;;  %v2181_v42 = vpack.c.bf16 %v1339_v37, %v1337_v36 }
 0x5a1   :  { %2130 = vmatprep.subr.bf16.mxu0 %v2129_v0  ;;  %v1322_v0 = vld [vmem:[#allocation2 + $0x1150] sm:$0xff]  ;;  %v1461_v37 = vld [vmem:[#allocation2 + $0x12e0] sm:$0xff] }
 0x5a2   :  { %v2167_v3 = vpack.c.bf16 %v1322_v0, %v1320_v63  ;;  %v1444_v63 = vld [vmem:[#allocation2 + $0x1258] sm:$0xff] }
 0x5a4   :  { %2132 = vmatpush1.bf16.msra.mxu0 %v2131_v5  ;;  %v1324_v5 = vld [vmem:[#allocation2 + $0x1160] sm:$0xff] }
 0x5a5   :  { %2134 = vmatprep.subr.bf16.mxu0 %v2133_v6  ;;  %v1326_v6 = vld [vmem:[#allocation2 + $0x1170] sm:$0xff] }
 0x5a6   :  { %v2171_v9 = vpack.c.bf16 %v1326_v6, %v1324_v5  ;;  %v1448_v5 = vld [vmem:[#allocation2 + $0x1278] sm:$0xff] }
 0x5a8   :  { %2136 = vmatpush1.bf16.msra.mxu0 %v2135_v11  ;;  %v1328_v11 = vld [vmem:[#allocation2 + $0x1180] sm:$0xff] }
 0x5a9   :  { %2138 = vmatprep.subr.bf16.mxu0 %v2137_v12  ;;  %v1330_v12 = vld [vmem:[#allocation2 + $0x1190] sm:$0xff] }
 0x5aa   :  { %v2175_v15 = vpack.c.bf16 %v1330_v12, %v1328_v11  ;;  %v1452_v11 = vld [vmem:[#allocation2 + $0x1298] sm:$0xff] }
 0x5ac   :  { %2140 = vmatpush1.bf16.msra.mxu0 %v2139_v17  ;;  %v1332_v17 = vld [vmem:[#allocation2 + $0x11a0] sm:$0xff] }
 0x5ad   :  { %2142 = vmatprep.subr.bf16.mxu0 %v2141_v18  ;;  %v1334_v18 = vld [vmem:[#allocation2 + $0x11b0] sm:$0xff] }
 0x5ae   :  { %v2179_v19 = vpack.c.bf16 %v1334_v18, %v1332_v17  ;;  %v1456_v17 = vld [vmem:[#allocation2 + $0x12b8] sm:$0xff] }
 0x5b0   :  { %2144 = vmatpush1.bf16.msra.mxu0 %v2143_v25 }
 0x5b1   :  { %2146 = vmatprep.subr.bf16.mxu0 %v2145_v27 }
 0x5b4   :  { %2148 = vmatpush1.bf16.msra.mxu0 %v2147_v34 }
 0x5b5   :  { %2150 = vmatprep.subr.bf16.mxu0 %v2149_v35 }
 0x5b8   :  { %2152 = vmatpush1.bf16.msra.mxu0 %v2151_v44  ;;  %v1338_v44 = vld [vmem:[#allocation2 + $0x11d0] sm:$0xff] }
 0x5b9   :  { %2154 = vmatprep.subr.bf16.mxu0 %v2153_v22  ;;  %v2183_v22 = vpack.c.bf16 %v1338_v44, %v1336_v43  ;;  %v1466_v43 = vld [vmem:[#allocation2 + $0x1308] sm:$0xff]  ;;  %v1468_v44 = vld [vmem:[#allocation2 + $0x1318] sm:$0xff] }
 0x5ba   :  { %v2221_v45 = vpack.c.bf16 %v1468_v44, %v1466_v43  ;;  %v1493_v44 = vld [vmem:[#allocation2 + $0x13e0] sm:$0xff] }
 0x5bc   :  { %2156 = vmatpush1.bf16.msra.mxu0 %v2155_v49  ;;  %v1342_v49 = vld [vmem:[#allocation2 + $0x11f0] sm:$0xff] }
 0x5bd   :  { %2158 = vmatprep.subr.bf16.mxu0 %v2157_v50  ;;  %v2187_v50 = vpack.c.bf16 %v1342_v49, %v1340_v48  ;;  %v1470_v48 = vld [vmem:[#allocation2 + $0x1328] sm:$0xff]  ;;  %v1472_v49 = vld [vmem:[#allocation2 + $0x1338] sm:$0xff] }
 0x5be   :  { %v2225_v51 = vpack.c.bf16 %v1472_v49, %v1470_v48 }
 0x5c0   :  { %2160 = vmatpush1.bf16.msra.mxu0 %v2159_v55  ;;  %v1435_v55 = vld [vmem:[#allocation2 + $0x1210] sm:$0xff] }
 0x5c1   :  { %2162 = vmatprep.subr.bf16.mxu0 %v2161_v56  ;;  %v1438_v56 = vld [vmem:[#allocation2 + $0x1228] sm:$0xff]  ;;  %v2191_v58 = vpack.c.bf16 %v1435_v55, %v1433_v53  ;;  %v1471_v53 = vld [vmem:[#allocation2 + $0x1330] sm:$0xff]  ;;  %v1476_v55 = vld [vmem:[#allocation2 + $0x1358] sm:$0xff] }
 0x5c2   :  { %v2193_v59 = vpack.c.bf16 %v1440_v57, %v1438_v56  ;;  %v2227_v56 = vpack.c.bf16 %v1471_v53, %v1469_v52  ;;  %v2229_v57 = vpack.c.bf16 %v1476_v55, %v1474_v54 }
 0x5c4   :  { %2164 = vmatpush1.bf16.msra.mxu0 %v2163_v61  ;;  %v1439_v61 = vld [vmem:[#allocation2 + $0x1230] sm:$0xff] }
 0x5c5   :  { %2166 = vmatprep.subr.bf16.mxu0 %v2165_v62  ;;  %v1442_v62 = vld [vmem:[#allocation2 + $0x1248] sm:$0xff]  ;;  %v2195_v0 = vpack.c.bf16 %v1439_v61, %v1437_v60  ;;  %v1480_v61 = vld [vmem:[#allocation2 + $0x1378] sm:$0xff] }
 0x5c6   :  { %v2197_v1 = vpack.c.bf16 %v1444_v63, %v1442_v62  ;;  %v1478_v60 = vld [vmem:[#allocation2 + $0x1368] sm:$0xff] }
 0x5c7   :  { %v2233_v63 = vpack.c.bf16 %v1480_v61, %v1478_v60 }
 0x5c8   :  { %2168 = vmatpush1.bf16.msra.mxu0 %v2167_v3  ;;  %v1443_v3 = vld [vmem:[#allocation2 + $0x1250] sm:$0xff] }
 0x5c9   :  { %2170 = vmatprep.subr.bf16.mxu0 %v2169_v4  ;;  %v1446_v4 = vld [vmem:[#allocation2 + $0x1268] sm:$0xff]  ;;  %v2199_v6 = vpack.c.bf16 %v1443_v3, %v1441_v2  ;;  %v1484_v3 = vld [vmem:[#allocation2 + $0x1398] sm:$0xff] }
 0x5ca   :  { %v2201_v7 = vpack.c.bf16 %v1448_v5, %v1446_v4  ;;  %v1482_v2 = vld [vmem:[#allocation2 + $0x1388] sm:$0xff] }
 0x5cb   :  { %v2237_v5 = vpack.c.bf16 %v1484_v3, %v1482_v2 }
 0x5cc   :  { %2172 = vmatpush1.bf16.msra.mxu0 %v2171_v9  ;;  %v1447_v9 = vld [vmem:[#allocation2 + $0x1270] sm:$0xff] }
 0x5cd   :  { %2174 = vmatprep.subr.bf16.mxu0 %v2173_v10  ;;  %v1450_v10 = vld [vmem:[#allocation2 + $0x1288] sm:$0xff]  ;;  %v2203_v12 = vpack.c.bf16 %v1447_v9, %v1445_v8  ;;  %v1488_v9 = vld [vmem:[#allocation2 + $0x13b8] sm:$0xff] }
 0x5ce   :  { %v2205_v13 = vpack.c.bf16 %v1452_v11, %v1450_v10  ;;  %v1486_v8 = vld [vmem:[#allocation2 + $0x13a8] sm:$0xff] }
 0x5cf   :  { %v2241_v11 = vpack.c.bf16 %v1488_v9, %v1486_v8 }
 0x5d0   :  { %2176 = vmatpush1.bf16.msra.mxu0 %v2175_v15  ;;  %v1451_v15 = vld [vmem:[#allocation2 + $0x1290] sm:$0xff] }
 0x5d1   :  { %2178 = vmatprep.subr.bf16.mxu0 %v2177_v16  ;;  %v1454_v16 = vld [vmem:[#allocation2 + $0x12a8] sm:$0xff]  ;;  %v2207_v18 = vpack.c.bf16 %v1451_v15, %v1449_v14 }
 0x5d2   :  { %v1192_v15 = vld [vmem:[#allocation4 + $0xe] sm:$0x3] }
 0x5d4   :  { %2180 = vmatpush1.bf16.msra.mxu0 %v2179_v19  ;;  %v2209_v19 = vpack.c.bf16 %v1456_v17, %v1454_v16  ;;  %v1197_v16 = vrot.slane %v1192_v15, %v2378_v24  ;;  %v1201_v17 = vrot.slane %v1192_v15, %v2380_v26 }
 0x5d5   :  { %2182 = vmatprep.subr.bf16.mxu0 %v2181_v42  ;;  %v1463_v42 = vld [vmem:[#allocation2 + $0x12f0] sm:$0xff] }
 0x5d8   :  { %2184 = vmatpush1.bf16.msra.mxu0 %v2183_v22  ;;  %v2219_v22 = vpack.c.bf16 %v1463_v42, %v1461_v37  ;;  %v1494_v37 = vld [vmem:[#allocation2 + $0x13e8] sm:$0xff]  ;;  %v1496_v42 = vld [vmem:[#allocation2 + $0x13f8] sm:$0xff] }
 0x5d9   :  { %2186 = vmatprep.subr.bf16.mxu0 %v2185_v47  ;;  %v1467_v47 = vld [vmem:[#allocation2 + $0x1310] sm:$0xff]  ;;  %v2249_v43 = vpack.c.bf16 %v1496_v42, %v1494_v37 }
 0x5dc   :  { %2188 = vmatpush1.bf16.msra.mxu0 %v2187_v50  ;;  %v2223_v50 = vpack.c.bf16 %v1467_v47, %v1465_v46  ;;  %v1345_v46 = vld [vmem:[#allocation4 + $0x10] sm:$0x3] }
 0x5dd   :  { %v1350_v47 = vrot.slane %v1345_v46, %v2378_v24  ;;  %v1354_v48 = vrot.slane %v1345_v46, %v2380_v26 }
 0x672   :  { %v1117_v25 = vpop.f32.mrb[6].mxu0 }
 0x673   :  { %v1118_v27 = vadd.f32 %v1117_v25, %v1044_v21  ;;  %v1119_v28 = vpop.f32.mrb[7].mxu0  ;;  %v1455_v21 = vld [vmem:[#allocation2 + $0x12b0] sm:$0xff]  ;;  %v1460_v25 = vld [vmem:[#allocation2 + $0x12d8] sm:$0xff] }
 0x674   :  { %v1120_v29 = vadd.f32 %v1119_v28, %v1048_v23  ;;  %v1458_v23 = vld [vmem:[#allocation2 + $0x12c8] sm:$0xff] }
 0x675   :  { %v1122_v30 = vmul.f32 0.1, %v1118_v27  ;;  %v2213_v28 = vpack.c.bf16 %v1460_v25, %v1458_v23 }
 0x676   :  { %v1123_v32 = vmul.f32 0.1, %v1120_v29 }
 0x677   :  { %v1124_v35 = vmax.f32 %v1118_v27, %v1122_v30  ;;  %v2211_v27 = vpack.c.bf16 %v1455_v21, %v1453_v20  ;;  %v1459_v30 = vld [vmem:[#allocation2 + $0x12d0] sm:$0xff] }
 0x678   :  { %v1125_v34 = vmax.f32 %v1120_v29, %v1123_v32  ;;  %v1457_v29 = vld [vmem:[#allocation2 + $0x12c0] sm:$0xff]  ;;  %v1462_v32 = vld [vmem:[#allocation2 + $0x12e8] sm:$0xff] }
 0x67a   :  { %1268 = vmatprep.mubr.f32.mxu1 %v1125_v34  ;;  %v1464_v34 = vld [vmem:[#allocation2 + $0x12f8] sm:$0xff] }
 0x67b   :  { %1269 = vmatmul.mubr.f32.vlgmr.msra.gmra.mrb[6].mxu1 %v1124_v35  ;;  %v2215_v35 = vpack.c.bf16 %v1459_v30, %v1457_v29  ;;  %v2217_v36 = vpack.c.bf16 %v1464_v34, %v1462_v32  ;;  %v1490_v29 = vld [vmem:[#allocation2 + $0x13c8] sm:$0xff]  ;;  %v1492_v30 = vld [vmem:[#allocation2 + $0x13d8] sm:$0xff]  ;;  %v1489_v34 = vld [vmem:[#allocation2 + $0x13c0] sm:$0xff] }
 0x67c   :  { %2192 = vmatpush1.bf16.msra.mxu1 %v2191_v58  ;;  %v1473_v58 = vld [vmem:[#allocation2 + $0x1340] sm:$0xff]  ;;  %v2245_v32 = vpack.c.bf16 %v1492_v30, %v1490_v29 }
 0x67d   :  { %2194 = vmatprep.subr.bf16.mxu1 %v2193_v59  ;;  %v1475_v59 = vld [vmem:[#allocation2 + $0x1350] sm:$0xff] }
 0x67e   :  { %v2231_v62 = vpack.c.bf16 %v1475_v59, %v1473_v58 }
 0x680   :  { %2196 = vmatpush1.bf16.msra.mxu1 %v2195_v0  ;;  %v1477_v0 = vld [vmem:[#allocation2 + $0x1360] sm:$0xff] }
 0x681   :  { %2198 = vmatprep.subr.bf16.mxu1 %v2197_v1  ;;  %v1479_v1 = vld [vmem:[#allocation2 + $0x1370] sm:$0xff] }
 0x682   :  { %v2235_v4 = vpack.c.bf16 %v1479_v1, %v1477_v0 }
 0x684   :  { %2200 = vmatpush1.bf16.msra.mxu1 %v2199_v6  ;;  %v1481_v6 = vld [vmem:[#allocation2 + $0x1380] sm:$0xff] }
 0x685   :  { %2202 = vmatprep.subr.bf16.mxu1 %v2201_v7  ;;  %v1483_v7 = vld [vmem:[#allocation2 + $0x1390] sm:$0xff] }
 0x686   :  { %v2239_v10 = vpack.c.bf16 %v1483_v7, %v1481_v6 }
 0x688   :  { %2204 = vmatpush1.bf16.msra.mxu1 %v2203_v12  ;;  %v1485_v12 = vld [vmem:[#allocation2 + $0x13a0] sm:$0xff] }
 0x689   :  { %2206 = vmatprep.subr.bf16.mxu1 %v2205_v13  ;;  %v1487_v13 = vld [vmem:[#allocation2 + $0x13b0] sm:$0xff] }
 0x68a   :  { %v2243_v14 = vpack.c.bf16 %v1487_v13, %v1485_v12 }
 0x68c   :  { %2208 = vmatpush1.bf16.msra.mxu1 %v2207_v18 }
 0x68d   :  { %2210 = vmatprep.subr.bf16.mxu1 %v2209_v19 }
 0x690   :  { %2212 = vmatpush1.bf16.msra.mxu1 %v2211_v27 }
 0x691   :  { %2214 = vmatprep.subr.bf16.mxu1 %v2213_v28 }
 0x694   :  { %2216 = vmatpush1.bf16.msra.mxu1 %v2215_v35  ;;  %v1491_v35 = vld [vmem:[#allocation2 + $0x13d0] sm:$0xff] }
 0x695   :  { %2218 = vmatprep.subr.bf16.mxu1 %v2217_v36  ;;  %v2247_v36 = vpack.c.bf16 %v1491_v35, %v1489_v34 }
 0x698   :  { %2220 = vmatpush1.bf16.msra.mxu1 %v2219_v22  ;;  %v1495_v22 = vld [vmem:[#allocation2 + $0x13f0] sm:$0xff] }
 0x699   :  { %2222 = vmatprep.subr.bf16.mxu1 %v2221_v45  ;;  %v2251_v45 = vpack.c.bf16 %v1495_v22, %v1493_v44 }
 0x69c   :  { %2224 = vmatpush1.bf16.msra.mxu1 %v2223_v50 }
 0x69d   :  { %2226 = vmatprep.subr.bf16.mxu1 %v2225_v51 }
 0x6a0   :  { %2228 = vmatpush1.bf16.msra.mxu1 %v2227_v56 }
 0x6a1   :  { %2230 = vmatprep.subr.bf16.mxu1 %v2229_v57  ;;  %v1498_v57 = vld [vmem:[#allocation4 + $0x12] sm:$0x3] }
 0x6a2   :  { %v1503_v58 = vrot.slane %v1498_v57, %v2378_v24  ;;  %v1507_v59 = vrot.slane %v1498_v57, %v2380_v26 }
 0x6a4   :  { %2232 = vmatpush1.bf16.msra.mxu1 %v2231_v62 }
 0x6a5   :  { %2234 = vmatprep.subr.bf16.mxu1 %v2233_v63 }
 0x6a8   :  { %2236 = vmatpush1.bf16.msra.mxu1 %v2235_v4 }
 0x6a9   :  { %2238 = vmatprep.subr.bf16.mxu1 %v2237_v5 }
 0x6ac   :  { %2240 = vmatpush1.bf16.msra.mxu1 %v2239_v10 }
 0x6ad   :  { %2242 = vmatprep.subr.bf16.mxu1 %v2241_v11 }
 0x6b0   :  { %2244 = vmatpush1.bf16.msra.mxu1 %v2243_v14 }
 0x6b1   :  { %2246 = vmatprep.subr.bf16.mxu1 %v2245_v32 }
 0x6b4   :  { %2248 = vmatpush1.bf16.msra.mxu1 %v2247_v36 }
 0x6b5   :  { %2250 = vmatprep.subr.bf16.mxu1 %v2249_v43 }
 0x6b8   :  { %2252 = vmatpush1.bf16.msra.mxu1 %v2251_v45 }
 0x74e   :  { %v1270_v18 = vpop.f32.mrb[6].mxu1 }
 0x74f   :  { %v1271_v19 = vadd.f32 %v1270_v18, %v1197_v16  ;;  %v1272_v20 = vpop.f32.mrb[7].mxu1 }
 0x750   :  { %v1273_v21 = vadd.f32 %v1272_v20, %v1201_v17 }
 0x751   :  { %v1275_v23 = vmul.f32 0.1, %v1271_v19 }
 0x752   :  { %v1276_v25 = vmul.f32 0.1, %v1273_v21 }
 0x753   :  { %v1277_v28 = vmax.f32 %v1271_v19, %v1275_v23 }
 0x754   :  { %v1278_v27 = vmax.f32 %v1273_v21, %v1276_v25 }
 0x756   :  { %1421 = vmatprep.mubr.f32.mxu0 %v1278_v27 }
 0x757   :  { %1422 = vmatmul.mubr.f32.vlgmr.msra.gmra.mrb[8].mxu0 %v1277_v28 }
 0x82a   :  { %v1423_v49 = vpop.f32.mrb[8].mxu0 }
 0x82b   :  { %v1424_v50 = vadd.f32 %v1423_v49, %v1350_v47  ;;  %v1425_v51 = vpop.f32.mrb[9].mxu0 }
 0x82c   :  { %v1426_v52 = vadd.f32 %v1425_v51, %v1354_v48 }
 0x82d   :  { %v1428_v53 = vmul.f32 0.1, %v1424_v50 }
 0x82e   :  { %v1429_v54 = vmul.f32 0.1, %v1426_v52 }
 0x82f   :  { %v1430_v56 = vmax.f32 %v1424_v50, %v1428_v53 }
 0x830   :  { %v1431_v55 = vmax.f32 %v1426_v52, %v1429_v54 }
 0x832   :  { %1574 = vmatprep.mubr.f32.mxu1 %v1431_v55 }
 0x833   :  { %1575 = vmatmul.mubr.f32.vlgmr.msra.gmra.mrb[8].mxu1 %v1430_v56 }
 0x906   :  { %v1576_v60 = vpop.f32.mrb[8].mxu1 }
 0x907   :  { %v1577_v61 = vadd.f32 %v1576_v60, %v1503_v58  ;;  %v1578_v62 = vpop.f32.mrb[9].mxu1 }
 0x908   :  { %v1579_v63 = vadd.f32 %v1578_v62, %v1507_v59 }
 0x909   :  { %v1581_v0 = vand.u32 2147483647, %v1577_v61  ;;  %vm1595_vm4 = vcmp.ge.f32.partialorder %v1577_v61, 0.0 }
 0x90a   :  { %v1582_v1 = vand.u32 2147483647, %v1579_v63  ;;  %vm1596_vm5 = vcmp.ge.f32.partialorder %v1579_v63, 0.0 }
 0x90b   :  { %v1583_v2 = vsub.f32 0.0, %v1581_v0 }
 0x90c   :  { %v1584_v3 = vsub.f32 0.0, %v1582_v1 }
 0x90d   :  { %v1585_v4 = vmul.f32 1.442695, %v1583_v2 }
 0x90e   :  { %v1587_v5 = vmul.f32 1.442695, %v1584_v3 }
 0x90f   :  { %2263 = vpow2.f32 %v1585_v4 }
 0x910   :  { %2265 = vpow2.f32 %v1587_v5 }
 0x919   :  { %v2264_v6 = vpop.eup %2263 }
 0x91a   :  { %v2266_v7 = vpop.eup %2265  ;;  %v1589_v8 = vadd.f32 1.0, %v2264_v6 }
 0x91b   :  { %v1590_v9 = vadd.f32 1.0, %v2266_v7 }
 0x91c   :  { %2267 = vrcp.f32 %v1589_v8 }
 0x91d   :  { %2269 = vrcp.f32 %v1590_v9 }
 0x926   :  { %v2268_v24 = vpop.eup %2267 }
 0x927   :  { %v2270_v26 = vpop.eup %2269  ;;  %v1597_v10 = vmul.f32 %v2268_v24, %v2264_v6 }
 0x928   :  { %v1598_v11 = vmul.f32 %v2270_v26, %v2266_v7 }
 0x929   :  { %v1599_v12 = vsel %vm1595_vm4, %v2268_v24, %v1597_v10 }
 0x92a   :  { %v1603_v13 = vsel %vm1601_vm2, %v1599_v12, %v2392_v31  ;;  %v1600_v14 = vsel %vm1596_vm5, %v2270_v26, %v1598_v11 }
 0x92b   :  { %1605 = vst [vmem:[%s2443_s3] sm:$0xff] %v1603_v13  ;;  %v1604_v15 = vsel %vm1602_vm3, %v1600_v14, %v2394_v33 }
 0x92c   :  { %1606 = vst [vmem:[%s2443_s3 + $0x8] sm:$0xff] %v1604_v15 }
 0x92d   :  { %1611 = vsyncpa [#allocation3], 1 }
 0x92e   :  { %1612 = vsyncpa [#allocation5], 1 }

</bundles_post_ra>
